<compile_context>
chip_gen: v7x
topology: tpu7x:2x2x1
jax: 0.10.0
libtpu: 0.0.40
codegen_flags: <defaults>
</compile_context>

<pallas_src>
import jax
import jax.numpy as jnp
from jax.experimental import pallas as pl
from jax.experimental.pallas import tpu as pltpu


# ---------------------------------------------------------------------------
# Fused-gather kernel: embedding table resident in VMEM, gather realised as a
# weighted multi-hot matmul on the MXU.  All tiles are batch-last.
# ---------------------------------------------------------------------------
def _fm_fused_kernel(ids_ref, vals_ref, table_ref, bias_ref, gbias_ref, o_ref):
    F, bm = ids_ref.shape
    D, Np = table_ref.shape

    n_iota = jax.lax.broadcasted_iota(jnp.int32, (Np, bm), 0)

    # W[n, b]  = sum_f [ids[f,b]==n] * vals[f,b]
    # W2[n, b] = sum_f [ids[f,b]==n] * vals[f,b]^2
    w = jnp.zeros((Np, bm), jnp.float32)
    w2 = jnp.zeros((Np, bm), jnp.float32)
    for f in range(F):                               # F tiny & static -> unrolled
        v = vals_ref[f][None, :]                     # (1, bm)
        hit = ids_ref[f][None, :] == n_iota          # (Np, bm)
        wv = jnp.where(hit, v, 0.0)
        w = w + wv
        w2 = w2 + wv * v

    tab = table_ref[...]                             # (D, Np), VMEM-resident
    s = jnp.dot(tab, w, preferred_element_type=jnp.float32,
                precision=jax.lax.Precision.HIGHEST)                 # (D, bm)
    ss = jnp.dot(tab * tab, w2, preferred_element_type=jnp.float32,
                 precision=jax.lax.Precision.HIGHEST)                # (D, bm)
    linear = jnp.dot(bias_ref[...], w, preferred_element_type=jnp.float32,
                     precision=jax.lax.Precision.HIGHEST)            # (1, bm)

    inter = jnp.sum(s * s - ss, axis=0, keepdims=True) * (0.5 / D)   # (1, bm)
    o_ref[...] = inter + linear + gbias_ref[0]


def fm_pallas_fused(ids_t, vals_t, table_t, bias_t, gbias, *, bm):
    """ids_t/vals_t: (F, Bp); table_t: (D, Np); bias_t: (1, Np); gbias: (1,)."""
    F, Bp = ids_t.shape
    D, Np = table_t.shape
    n_tiles = Bp // bm

    flops = int(Bp * (2 * Np * (2 * D + 1) + 5 * F * Np + 3 * D))
    bytes_accessed = int(Bp * 4 * (2 * F + 1) + 4 * (D + 1) * Np)

    out = pl.pallas_call(
        _fm_fused_kernel,
        out_shape=jax.ShapeDtypeStruct((1, Bp), jnp.float32),
        grid_spec=pltpu.PrefetchScalarGridSpec(
            num_scalar_prefetch=0,
            grid=(n_tiles,),
            in_specs=[
                pl.BlockSpec((F, bm), lambda i: (0, i)),            # ids, batch on lanes
                pl.BlockSpec((F, bm), lambda i: (0, i)),            # vals, batch on lanes
                pl.BlockSpec((D, Np), lambda i: (0, 0)),            # E^T, resident
                pl.BlockSpec((1, Np), lambda i: (0, 0)),            # bias row, resident
                pl.BlockSpec(memory_space=pltpu.MemorySpace.SMEM),  # global bias scalar
            ],
            out_specs=pl.BlockSpec((1, bm), lambda i: (0, i)),      # lane-dense output
        ),
        compiler_params=pltpu.CompilerParams(dimension_semantics=("parallel",)),
        cost_estimate=pl.CostEstimate(
            flops=flops, transcendentals=0, bytes_accessed=bytes_accessed),
    )(ids_t, vals_t, table_t, bias_t, gbias)
    return out.reshape(Bp)


# ---------------------------------------------------------------------------
# Fallback kernel for large tables: gather stays in XLA, kernel gets
# batch-last (F, D, bm) tiles and accumulates over the F fields on the VPU.
# ---------------------------------------------------------------------------
def _fm_gathered_kernel(emb_ref, vals_ref, fbias_ref, gbias_ref, o_ref):
    F, D, bm = emb_ref.shape
    s = jnp.zeros((D, bm), jnp.float32)
    ss = jnp.zeros((D, bm), jnp.float32)
    linear = jnp.zeros((1, bm), jnp.float32)
    for f in range(F):                               # static unroll over fields
        v = vals_ref[f][None, :]                     # (1, bm)
        e = emb_ref[f] * v                           # (D, bm)
        s = s + e
        ss = ss + e * e
        linear = linear + fbias_ref[f][None, :] * v
    inter = jnp.sum(s * s - ss, axis=0, keepdims=True) * (0.5 / D)
    o_ref[...] = inter + linear + gbias_ref[0]


def fm_pallas_gathered(emb_t, vals_t, fbias_t, gbias, *, bm):
    """emb_t: (F, D, Bp); vals_t/fbias_t: (F, Bp); gbias: (1,)."""
    F, D, Bp = emb_t.shape
    n_tiles = Bp // bm
    flops = int(Bp * (5 * F * D + 3 * D + 3 * F))
    bytes_accessed = int(Bp * 4 * (F * D + 2 * F + 1))

    out = pl.pallas_call(
        _fm_gathered_kernel,
        out_shape=jax.ShapeDtypeStruct((1, Bp), jnp.float32),
        grid_spec=pltpu.PrefetchScalarGridSpec(
            num_scalar_prefetch=0,
            grid=(n_tiles,),
            in_specs=[
                pl.BlockSpec((F, D, bm), lambda i: (0, 0, i)),      # gathered E, batch-last
                pl.BlockSpec((F, bm), lambda i: (0, i)),
                pl.BlockSpec((F, bm), lambda i: (0, i)),
                pl.BlockSpec(memory_space=pltpu.MemorySpace.SMEM),
            ],
            out_specs=pl.BlockSpec((1, bm), lambda i: (0, i)),
        ),
        compiler_params=pltpu.CompilerParams(dimension_semantics=("parallel",)),
        cost_estimate=pl.CostEstimate(
            flops=flops, transcendentals=0, bytes_accessed=bytes_accessed),
    )(emb_t, vals_t, fbias_t, gbias)
    return out.reshape(Bp)


# ---------------------------------------------------------------------------
# Wrapper
# ---------------------------------------------------------------------------
def _pick_bm(batch, bm):
    if bm is None:
        bm = 1024
    bm = max(128, (int(bm) // 128) * 128)
    # Keep the parallel grid axis at >= 2 steps whenever the batch allows it
    # (shards across v7x's two TensorCores, gives the pipeline overlap).
    while bm > 128 and pl.cdiv(batch, bm) < 2:
        bm = max(128, ((bm // 2) // 128) * 128)
    return bm


def fm_forward(feature_embeddings, feature_biases, global_bias,
               feature_ids, feature_vals, *, bm=None, use_fused=None):
    B, F = feature_ids.shape
    N, D = feature_embeddings.shape
    bm = _pick_bm(B, bm)
    n_tiles = pl.cdiv(B, bm)
    Bp = n_tiles * bm

    # Pad the tiny (B, F) inputs BEFORE any gather; padded ids are 0 (valid
    # row) so the padded tail computes to global_bias and is sliced off.
    if Bp != B:
        pad = Bp - B
        feature_ids = jnp.pad(feature_ids, ((0, pad), (0, 0)))
        feature_vals = jnp.pad(feature_vals, ((0, pad), (0, 0)))

    ids_t = feature_ids.T.astype(jnp.int32)               # (F, Bp) batch-last
    vals_t = feature_vals.T.astype(jnp.float32)           # (F, Bp)
    gbias = global_bias.reshape(1).astype(jnp.float32)

    Np = ((N + 127) // 128) * 128
    if use_fused is None:
        use_fused = Np * bm <= (1 << 20)   # keep the in-kernel one-hot scratch small

    if use_fused:
        table_t = jnp.pad(feature_embeddings.T.astype(jnp.float32),
                          ((0, 0), (0, Np - N)))           # (D, Np)
        bias_t = jnp.pad(feature_biases.reshape(1, -1).astype(jnp.float32),
                         ((0, 0), (0, Np - N)))            # (1, Np)
        out = fm_pallas_fused(ids_t, vals_t, table_t, bias_t, gbias, bm=bm)
    else:
        # Large table: gather in XLA, kernel still gets batch-last tiles.
        emb_t = jnp.transpose(
            feature_embeddings[feature_ids].astype(jnp.float32), (1, 2, 0))   # (F, D, Bp)
        fbias_t = feature_biases[feature_ids][..., 0].T.astype(jnp.float32)   # (F, Bp)
        out = fm_pallas_gathered(emb_t, vals_t, fbias_t, gbias, bm=bm)
    return out[:B]


def fm_reference(feature_embeddings, feature_biases, global_bias,
                 feature_ids, feature_vals):
    e = feature_embeddings[feature_ids] * feature_vals[:, :, None]
    square_sum = jnp.sum(e ** 2, axis=1)
    sum_square = jnp.sum(e, axis=1) ** 2
    pred = jnp.mean((sum_square - square_sum) / 2.0, axis=1)
    fb = feature_biases[feature_ids][..., 0] * feature_vals
    return pred + jnp.sum(fb, axis=1) + global_bias[0]


if __name__ == "__main__":
    key = jax.random.PRNGKey(0)
    k_emb, k_bias, k_ids, k_vals = jax.random.split(key, 4)

    num_features = 100
    embedding_dim = 16
    num_fields = 3
    batch = 200            # NOT a multiple of 128 -> exercises tail padding

    # xavier_normal_ init, matching the PyTorch module.
    emb_std = (2.0 / (num_features + embedding_dim)) ** 0.5
    feature_embeddings = emb_std * jax.random.normal(
        k_emb, (num_features, embedding_dim), jnp.float32)
    bias_std = (2.0 / (num_features + 1)) ** 0.5
    feature_biases = bias_std * jax.random.normal(
        k_bias, (num_features, 1), jnp.float32)
    global_bias = jnp.zeros((1,), jnp.float32)

    feature_ids = jax.random.randint(k_ids, (batch, num_fields), 0, num_features)
    feature_vals = jax.random.uniform(k_vals, (batch, num_fields), jnp.float32)

    ref = fm_reference(feature_embeddings, feature_biases, global_bias,
                       feature_ids, feature_vals)

    # Path 1: fused in-kernel gather (small table).
    out_fused = jax.block_until_ready(
        fm_forward(feature_embeddings, feature_biases, global_bias,
                   feature_ids, feature_vals, use_fused=True))
    assert out_fused.shape == (batch,)
    assert jnp.allclose(out_fused, ref, atol=1e-4, rtol=1e-4), (out_fused, ref)

    # Path 2: large-table fallback (XLA gather, batch-last Pallas kernel).
    out_gath = jax.block_until_ready(
        fm_forward(feature_embeddings, feature_biases, global_bias,
                   feature_ids, feature_vals, use_fused=False))
    assert out_gath.shape == (batch,)
    assert jnp.allclose(out_gath, ref, atol=1e-4, rtol=1e-4), (out_gath, ref)

    print("KERNEL_OK")
</pallas_src>

<mosaic_0001>
module attributes {stable_mosaic.version = 11 : i64} {
  func.func @_fm_fused_kernel(%arg0: i32, %arg1: memref<3x128xi32, #tpu.memory_space<vmem>>, %arg2: memref<3x128xf32, #tpu.memory_space<vmem>>, %arg3: memref<16x128xf32, #tpu.memory_space<vmem>>, %arg4: memref<1x128xf32, #tpu.memory_space<vmem>>, %arg5: memref<1xf32, #tpu.memory_space<smem>>, %arg6: memref<1x128xf32, #tpu.memory_space<vmem>>) attributes {dimension_semantics = [#tpu.dimension_semantics<parallel>], iteration_bounds = array<i64: 2>, scalar_prefetch = 0 : i64, scratch_operands = 0 : i64, tpu.core_type = #tpu.core_type<tc>, window_params = [{transform_indices = @transform_0, window_bounds = array<i64: 3, 128>}, {transform_indices = @transform_1, window_bounds = array<i64: 3, 128>}, {pipeline_mode = #tpu.pipeline_mode<synchronous>, transform_indices = @transform_2, window_bounds = array<i64: 16, 128>}, {pipeline_mode = #tpu.pipeline_mode<synchronous>, transform_indices = @transform_3, window_bounds = array<i64: 1, 128>}, {transform_indices = @transform_4, window_bounds = array<i64: 1>}, {transform_indices = @transform_5, window_bounds = array<i64: 1, 128>}]} {
    %0 = tpu.iota {dimensions = array<i32: 0>} : vector<128x128xi32>
    %cst = arith.constant 0.000000e+00 : f32
    %1 = vector.broadcast %cst : f32 to vector<128x128xf32>
    %cst_0 = arith.constant 0.000000e+00 : f32
    %2 = vector.broadcast %cst_0 : f32 to vector<128x128xf32>
    %c0 = arith.constant 0 : index
    %c0_1 = arith.constant 0 : index
    %3 = vector.load %arg2[%c0, %c0_1] : memref<3x128xf32, #tpu.memory_space<vmem>>, vector<1x128xf32>
    %4 = vector.shape_cast %3 : vector<1x128xf32> to vector<128xf32>
    %5 = vector.shape_cast %4 : vector<128xf32> to vector<1x128xf32>
    %c0_2 = arith.constant 0 : index
    %c0_3 = arith.constant 0 : index
    %6 = vector.load %arg1[%c0_2, %c0_3] : memref<3x128xi32, #tpu.memory_space<vmem>>, vector<1x128xi32>
    %7 = vector.shape_cast %6 : vector<1x128xi32> to vector<128xi32>
    %8 = vector.shape_cast %7 : vector<128xi32> to vector<1x128xi32>
    %9 = vector.broadcast %8 : vector<1x128xi32> to vector<128x128xi32>
    %10 = arith.cmpi eq, %9, %0 : vector<128x128xi32>
    %cst_4 = arith.constant 0.000000e+00 : f32
    %11 = vector.shape_cast %5 : vector<1x128xf32> to vector<1x128xf32>
    %12 = vector.broadcast %11 : vector<1x128xf32> to vector<128x128xf32>
    %13 = vector.broadcast %cst_4 : f32 to vector<128x128xf32>
    %14 = arith.select %10, %12, %13 : vector<128x128xi1>, vector<128x128xf32>
    %15 = arith.addf %1, %14 : vector<128x128xf32>
    %16 = vector.broadcast %5 : vector<1x128xf32> to vector<128x128xf32>
    %17 = arith.mulf %14, %16 : vector<128x128xf32>
    %18 = arith.addf %2, %17 : vector<128x128xf32>
    %c1 = arith.constant 1 : index
    %c0_5 = arith.constant 0 : index
    %19 = vector.load %arg2[%c1, %c0_5] : memref<3x128xf32, #tpu.memory_space<vmem>>, vector<1x128xf32>
    %20 = vector.shape_cast %19 : vector<1x128xf32> to vector<128xf32>
    %21 = vector.shape_cast %20 : vector<128xf32> to vector<1x128xf32>
    %c1_6 = arith.constant 1 : index
    %c0_7 = arith.constant 0 : index
    %22 = vector.load %arg1[%c1_6, %c0_7] : memref<3x128xi32, #tpu.memory_space<vmem>>, vector<1x128xi32>
    %23 = vector.shape_cast %22 : vector<1x128xi32> to vector<128xi32>
    %24 = vector.shape_cast %23 : vector<128xi32> to vector<1x128xi32>
    %25 = vector.broadcast %24 : vector<1x128xi32> to vector<128x128xi32>
    %26 = arith.cmpi eq, %25, %0 : vector<128x128xi32>
    %cst_8 = arith.constant 0.000000e+00 : f32
    %27 = vector.shape_cast %21 : vector<1x128xf32> to vector<1x128xf32>
    %28 = vector.broadcast %27 : vector<1x128xf32> to vector<128x128xf32>
    %29 = vector.broadcast %cst_8 : f32 to vector<128x128xf32>
    %30 = arith.select %26, %28, %29 : vector<128x128xi1>, vector<128x128xf32>
    %31 = arith.addf %15, %30 : vector<128x128xf32>
    %32 = vector.broadcast %21 : vector<1x128xf32> to vector<128x128xf32>
    %33 = arith.mulf %30, %32 : vector<128x128xf32>
    %34 = arith.addf %18, %33 : vector<128x128xf32>
    %c2 = arith.constant 2 : index
    %c0_9 = arith.constant 0 : index
    %35 = vector.load %arg2[%c2, %c0_9] : memref<3x128xf32, #tpu.memory_space<vmem>>, vector<1x128xf32>
    %36 = vector.shape_cast %35 : vector<1x128xf32> to vector<128xf32>
    %37 = vector.shape_cast %36 : vector<128xf32> to vector<1x128xf32>
    %c2_10 = arith.constant 2 : index
    %c0_11 = arith.constant 0 : index
    %38 = vector.load %arg1[%c2_10, %c0_11] : memref<3x128xi32, #tpu.memory_space<vmem>>, vector<1x128xi32>
    %39 = vector.shape_cast %38 : vector<1x128xi32> to vector<128xi32>
    %40 = vector.shape_cast %39 : vector<128xi32> to vector<1x128xi32>
    %41 = vector.broadcast %40 : vector<1x128xi32> to vector<128x128xi32>
    %42 = arith.cmpi eq, %41, %0 : vector<128x128xi32>
    %cst_12 = arith.constant 0.000000e+00 : f32
    %43 = vector.shape_cast %37 : vector<1x128xf32> to vector<1x128xf32>
    %44 = vector.broadcast %43 : vector<1x128xf32> to vector<128x128xf32>
    %45 = vector.broadcast %cst_12 : f32 to vector<128x128xf32>
    %46 = arith.select %42, %44, %45 : vector<128x128xi1>, vector<128x128xf32>
    %47 = arith.addf %31, %46 : vector<128x128xf32>
    %48 = vector.broadcast %37 : vector<1x128xf32> to vector<128x128xf32>
    %49 = arith.mulf %46, %48 : vector<128x128xf32>
    %50 = arith.addf %34, %49 : vector<128x128xf32>
    %c0_13 = arith.constant 0 : index
    %c0_14 = arith.constant 0 : index
    %51 = vector.load %arg3[%c0_13, %c0_14] : memref<16x128xf32, #tpu.memory_space<vmem>>, vector<16x128xf32>
    %cst_15 = arith.constant dense<0.000000e+00> : vector<16x128xf32>
    %52 = tpu.matmul %51, %47, %cst_15 {dimension_numbers = #tpu.dot_dimension_numbers<[1], [0], [0], [1], [0, 0, 1, 1], [], []>, precision = #tpu.contract_precision<fp32>} : vector<16x128xf32>, vector<128x128xf32>, vector<16x128xf32> -> vector<16x128xf32>
    %53 = arith.mulf %51, %51 : vector<16x128xf32>
    %cst_16 = arith.constant dense<0.000000e+00> : vector<16x128xf32>
    %54 = tpu.matmul %53, %50, %cst_16 {dimension_numbers = #tpu.dot_dimension_numbers<[1], [0], [0], [1], [0, 0, 1, 1], [], []>, precision = #tpu.contract_precision<fp32>} : vector<16x128xf32>, vector<128x128xf32>, vector<16x128xf32> -> vector<16x128xf32>
    %c0_17 = arith.constant 0 : index
    %c0_18 = arith.constant 0 : index
    %55 = vector.load %arg4[%c0_17, %c0_18] : memref<1x128xf32, #tpu.memory_space<vmem>>, vector<1x128xf32>
    %cst_19 = arith.constant dense<0.000000e+00> : vector<1x128xf32>
    %56 = tpu.matmul %55, %47, %cst_19 {dimension_numbers = #tpu.dot_dimension_numbers<[1], [0], [0], [1], [0, 0, 1, 1], [], []>, precision = #tpu.contract_precision<fp32>} : vector<1x128xf32>, vector<128x128xf32>, vector<1x128xf32> -> vector<1x128xf32>
    %57 = arith.mulf %52, %52 : vector<16x128xf32>
    %58 = arith.subf %57, %54 : vector<16x128xf32>
    %cst_20 = arith.constant dense<0.000000e+00> : vector<128xf32>
    %59 = vector.multi_reduction <add>, %58, %cst_20 [0] : vector<16x128xf32> to vector<128xf32>
    %60 = vector.shape_cast %59 : vector<128xf32> to vector<1x128xf32>
    %cst_21 = arith.constant 3.125000e-02 : f32
    %61 = vector.broadcast %cst_21 : f32 to vector<1x128xf32>
    %62 = arith.mulf %60, %61 : vector<1x128xf32>
    %63 = arith.addf %62, %56 : vector<1x128xf32>
    %c0_22 = arith.constant 0 : index
    %64 = memref.load %arg5[%c0_22] : memref<1xf32, #tpu.memory_space<smem>>
    %65 = vector.broadcast %64 : f32 to vector<1x128xf32>
    %66 = arith.addf %63, %65 : vector<1x128xf32>
    %c0_23 = arith.constant 0 : index
    %c0_24 = arith.constant 0 : index
    %67 = vector.load %arg6[%c0_23, %c0_24] : memref<1x128xf32, #tpu.memory_space<vmem>>, vector<1x128xf32>
    tpu.vector_store %arg6[%c0_23, %c0_24], %66 {strides = array<i32>} : memref<1x128xf32, #tpu.memory_space<vmem>>, vector<1x128xf32>,
    return
  }
  func.func @transform_0(%arg0: i32) -> (i32, i32) {
    %c0_i32 = arith.constant 0 : i32
    %c0_i32_0 = arith.constant 0 : i32
    return %c0_i32, %arg0 : i32, i32
  }
  func.func @transform_1(%arg0: i32) -> (i32, i32) {
    %c0_i32 = arith.constant 0 : i32
    %c0_i32_0 = arith.constant 0 : i32
    return %c0_i32, %arg0 : i32, i32
  }
  func.func @transform_2(%arg0: i32) -> (i32, i32) {
    %c0_i32 = arith.constant 0 : i32
    %c0_i32_0 = arith.constant 0 : i32
    %c0_i32_1 = arith.constant 0 : i32
    return %c0_i32, %c0_i32_0 : i32, i32
  }
  func.func @transform_3(%arg0: i32) -> (i32, i32) {
    %c0_i32 = arith.constant 0 : i32
    %c0_i32_0 = arith.constant 0 : i32
    %c0_i32_1 = arith.constant 0 : i32
    return %c0_i32, %c0_i32_0 : i32, i32
  }
  func.func @transform_4(%arg0: i32) -> i32 {
    %c0_i32 = arith.constant 0 : i32
    %c0_i32_0 = arith.constant 0 : i32
    return %c0_i32 : i32
  }
  func.func @transform_5(%arg0: i32) -> (i32, i32) {
    %c0_i32 = arith.constant 0 : i32
    %c0_i32_0 = arith.constant 0 : i32
    return %c0_i32, %arg0 : i32, i32
  }
}

</mosaic_0001>

<bundles_post_ra>
// kernel: tpu_custom_call.1
= control target key start
LH: loop header
LB: loop body
LE: loop exit
PB: predicated region body
PF: predicated region fallthrough
CT: control target
= control target key end

     0   :  { %s5926_s0 = inlined_call_operand.hbm [shape: s32[3,256], index: 0, kind: input, shape index: {}]   ;;  %s5927_s1 = inlined_call_operand.hbm [shape: f32[3,256], index: 1, kind: input, shape index: {}]   ;;  %s5928_s2 = inlined_call_operand.hbm [shape: f32[16,128], index: 2, kind: input, shape index: {}]   ;;  %s5929_s3 = inlined_call_operand.vmem [shape: f32[1,128], index: 3, kind: input, shape index: {}]   ;;  %s5930_s4 = inlined_call_operand.<no memory space> [shape: f32[1], index: 4, kind: input, shape index: {}]   ;;  %s5931_s5 = inlined_call_operand.hbm [shape: f32[1,256], index: 5, kind: output, shape index: {}]  }
   0x1   :  { %6028 = sst [smem:[#allocation36_spill]] %s5928_s2 }
   0x2   :  { %10 = sst [smem:[#allocation2]] %s5930_s4 }
   0x3   :  { %11 = vsyncpa [#allocation4], 0 }
   0x4   :  { %13 = vsyncpa [#allocation4 + $0x1], 0 }
   0x5   :  { %14 = vsyncpa [#allocation7], 0 }
   0x6   :  { %16 = vsyncpa [#allocation7 + $0x1], 0 }
   0x7   :  { %17 = vsyncpa [#allocation5], 0 }
   0x8   :  { %19 = vsyncpa [#allocation5 + $0x1], 0  ;;  %s4510_s20 = smov 0   ;;  %s4512_s21 = smov 0  }
   0x9   :  { %s4514_s22 = smov 0   ;;  %s4516_s23 = smov 0  }
   0xa LB: > { %s4531_s4 = sadd.s32 4294967295, %s4466_s23   ;;  %s2720_s24 = sadd.s32 4294967294, %s4466_s23   ;;  %s4466_s23 = sphi %s4516_s23, %s6159_s23   ;;  %s4462_s22 = sphi %s4514_s22, %s6158_s22   ;;  %s4458_s21 = sphi %s4512_s21, %s6157_s21   ;;  %s4454_s20 = sphi %s4510_s20, %s6156_s20  }
   0xb   : > { %p45_p0 = scmp.ne.s32.totalorder %s4458_s21, %s4454_s20  ;;  %p5932_p1 = scmp.eq.s32.totalorder %s4531_s4, 0 }
   0xc   : > { %p164_p3 = scmp.eq.s32.totalorder %s2720_s24, 1  ;;  %p2721_p5 = scmp.ge.s32.totalorder %s4466_s23, 1 }
   0xd   : > { %p4540_p4 = por %p5932_p1, %p45_p0  ;;  %p171_p7 = scmp.lt.s32.totalorder %s4466_s23, 3 }
   0xe   : > { %p4545_p6 = por %p164_p3, %p45_p0  ;;  %s4468_s28 = smov [#allocation8]  }
   0xf   : > { %s6029_s25 = scalar_select %p4540_p4, 1, 0 }
  0x10   : > { %s6030_s26 = scalar_select %p4545_p6, 1, 0 }
  0x11   : > { %p4550_p8 = pnand %p2721_p5, %p171_p7  ;;  %s183_s29 = sshll.u32 %s4468_s28, 4  ;;  %s4554_s29 = int_to_ptr.vmem [resolvable:$true] %s183_s29 }
  0x12   : > { %s4566_s6 = sadd.s32 1, %s4466_s23   ;;  %s32_s7 = sadd.s32 1, %s4462_s22 }
  0x13   : > { %s6031_s27 = scalar_select %p4550_p8, 1, 0 }
  0x14   : > { %p4247_p9 = pneg %p4550_p8  ;;  %s29_s8 = ssub.s32 %s4466_s23, %s4566_s6 }
  0x15   : > { %s6033_s2 = sld [smem:[#allocation36_spill]] }
  0x16   : > { %p4561_p11 = pnand %p4247_p9, %p5932_p1 }
  0x18   : > { %p4306_p13 = pneg %p4561_p11 }
  0x1b   : > { %s4304_s11 = scalar_lea.hbm %s6033_s2, 256 }
  0x1c   : > { %p4305_p12 = scmp.ne.s32.totalorder %s6033_s2, %s4304_s11  ;;  %p4311_p5 = scmp.lt.u32.totalorder %s4304_s11, %s6033_s2 }
  0x1e   : > { %p4307_p0 = pnand %p4306_p13, %p4305_p12 }
  0x20   : > { %p4308_p3 = pneg %p4307_p0 }
  0x22   : > { %p4313_p7 = pnand %p4311_p5, %p4308_p3 }
  0x24   : > { %4316 = shalt.err (!%p4313_p7)
}
  0x25   : > { %s4317_s16 = scalar_lea.vmem %s4554_s29, 256  ;;  %p4325_p2 = scmp.lt.s32.totalorder %s4554_s29, %s4554_s29 }
  0x26   : > { %p4318_p9 = scmp.ne.s32.totalorder %s4554_s29, %s4317_s16  ;;  %p4326_p6 = scmp.lt.s32.totalorder %s4317_s16, %s4317_s16 }
  0x28   : > { %p4320_p10 = pnand %p4318_p9, %p4306_p13  ;;  %p4327_p4 = por %p4326_p6, %p4325_p2 }
  0x2a   : > { %p4321_p1 = pneg %p4320_p10 }
  0x2c   : > { %p4328_p8 = pnand %p4327_p4, %p4321_p1 }
  0x2e   : > { %4331 = shalt.err (!%p4328_p8)
}
  0x2f   : > { %s4469_s17 = smov 128   ;;  %s4470_s18 = smov 8  }
  0x30   : > { %4250 = dma.hbm_to_vmem [thread:$0]  (!%p4561_p11), %s6033_s2, 256, %s4554_s29, [#allocation7], %s4469_s17, %s4469_s17, %s4470_s18  }
  0x31   : > { %p30_p2 = scmp.eq.s32.totalorder %s29_s8, 0  ;;  %p39_p1 = scmp.ne.s32.totalorder %s4462_s22, %s4458_s21 }
  0x32   : > { %p40_p4 = scmp.eq.s32.totalorder %s4466_s23, 0  ;;  %p4263_p6 = scmp.lt.s32.totalorder %s4466_s23, 2 }
  0x33   : > { %s4597_s28 = scalar_select %p30_p2, %s4462_s22, %s32_s7  }
  0x34   : > { %p41_p8 = por %p40_p4, %p39_p1  ;;  %p6034_p10 = scmp.eq.s32.totalorder %s4531_s4, 1 }
  0x35   : > { %s203_s10 = sand.u32 1, %s4462_s22   ;;  %s2725_s11 = sshll.u32 %s4466_s23, 6 }
  0x36   : > { %p4601_p12 = por %p6034_p10, %p39_p1  ;;  %s4607_s12 = sshll.u32 %s203_s10, 2 }
  0x37   : > { %s4612_s29 = scalar_lea.hbm %s5926_s0, %s2725_s11  ;;  %s207_s7 = scalar_lea.vmem [#allocation3], %s4607_s12 }
  0x38   : > { %s6035_s9 = scalar_select %p4601_p12, 1, 0 }
  0x39   : > { %s214_s8 = sshll.u32 %s207_s7, 4  ;;  %p4615_p11 = pnand %p4263_p6, %p41_p8  ;;  %s4619_s8 = int_to_ptr.vmem [resolvable:$true] %s214_s8 }
  0x3a   : > { %s4624_s17 = scalar_lea.hbm %s5927_s1, %s2725_s11  ;;  %s204_s18 = scalar_lea.sflag [#allocation4], %s203_s10 }
  0x3b   : > { %s4332_s19 = scalar_lea.hbm %s4612_s29, 64  ;;  %p4334_p0 = pneg %p4615_p11 }
  0x3c   : > { %p4333_p13 = scmp.ne.s32.totalorder %s4612_s29, %s4332_s19  ;;  %s4337_s13 = scalar_lea.hbm %s5926_s0, 128 }
  0x3d   : > { %p4338_p7 = scmp.lt.u32.totalorder %s4612_s29, %s5926_s0  ;;  %p4339_p9 = scmp.lt.u32.totalorder %s4337_s13, %s4332_s19 }
  0x3e   : > { %p4335_p3 = pnand %p4334_p0, %p4333_p13  ;;  %p4341_p1 = scmp.lt.u32.totalorder %s4332_s19, %s4612_s29 }
  0x3f   : > { %p4340_p2 = por %p4339_p9, %p4338_p7 }
  0x40   : > { %p4336_p5 = pneg %p4335_p3 }
  0x41   : > { %p4342_p4 = por %p4341_p1, %p4340_p2 }
  0x43   : > { %p4343_p6 = pnand %p4342_p4, %p4336_p5 }
  0x45   : > { %4346 = shalt.err (!%p4343_p6)
}
  0x46   : > { %s4347_s10 = scalar_lea.vmem %s4619_s8, 64  ;;  %s4471_s11 = smov [#allocation3]  }
  0x47   : > { %p4348_p8 = scmp.ne.s32.totalorder %s4619_s8, %s4347_s10  ;;  %s4352_s15 = sshll.u32 %s4471_s11, 4  ;;  %s4353_s15 = int_to_ptr.vmem [resolvable:$false] %s4352_s15 }
  0x48   : > { %s4354_s2 = scalar_lea.vmem %s4353_s15, 128  ;;  %p4355_p3 = scmp.lt.s32.totalorder %s4619_s8, %s4353_s15 }
  0x49   : > { %p4350_p10 = pnand %p4348_p8, %p4334_p0  ;;  %p4356_p7 = scmp.lt.s32.totalorder %s4354_s2, %s4347_s10 }
  0x4b   : > { %p4351_p13 = pneg %p4350_p10  ;;  %p4357_p9 = por %p4356_p7, %p4355_p3 }
  0x4d   : > { %p4358_p2 = pnand %p4357_p9, %p4351_p13 }
  0x4f   : > { %4361 = shalt.err (!%p4358_p2)
}
  0x50   : > { %4254 = dma.hbm_to_vmem [thread:$0]  (!%p4615_p11), %s4612_s29, 64, %s4619_s8, %s204_s18  }
  0x51   : > { %s221_s16 = sand.u32 1, %s4466_s23   ;;  %s225_s19 = scalar_lea.vmem [#allocation6], %s4607_s12 }
  0x52   : > { %s232_s24 = sshll.u32 %s225_s19, 4  ;;  %s222_s30 = scalar_lea.sflag [#allocation7], %s221_s16  ;;  %s233_s24 = int_to_ptr.vmem [resolvable:$true] %s232_s24 }
  0x53   : > { %s4362_s13 = scalar_lea.hbm %s4624_s17, 64  ;;  %s4367_s11 = scalar_lea.hbm %s5927_s1, 128 }
  0x54   : > { %p4363_p5 = scmp.ne.s32.totalorder %s4624_s17, %s4362_s13  ;;  %p4368_p6 = scmp.lt.u32.totalorder %s4624_s17, %s5927_s1 }
  0x55   : > { %p4369_p8 = scmp.lt.u32.totalorder %s4367_s11, %s4362_s13  ;;  %p4371_p13 = scmp.lt.u32.totalorder %s4362_s13, %s4624_s17 }
  0x56   : > { %p4365_p1 = pnand %p4363_p5, %p4334_p0 }
  0x57   : > { %p4370_p10 = por %p4369_p8, %p4368_p6 }
  0x58   : > { %p4366_p4 = pneg %p4365_p1 }
  0x59   : > { %p4372_p3 = por %p4371_p13, %p4370_p10 }
  0x5b   : > { %p4373_p7 = pnand %p4372_p3, %p4366_p4 }
  0x5d   : > { %4376 = shalt.err (!%p4373_p7)
}
  0x5e   : > { %s4377_s12 = scalar_lea.vmem %s233_s24, 64  ;;  %s4472_s29 = smov [#allocation6]  }
  0x5f   : > { %p4378_p9 = scmp.ne.s32.totalorder %s233_s24, %s4377_s12  ;;  %s4382_s8 = sshll.u32 %s4472_s29, 4  ;;  %s4383_s8 = int_to_ptr.vmem [resolvable:$false] %s4382_s8 }
  0x60   : > { %s4384_s18 = scalar_lea.vmem %s4383_s8, 128  ;;  %p4385_p1 = scmp.lt.s32.totalorder %s233_s24, %s4383_s8 }
  0x61   : > { %p4380_p2 = pnand %p4378_p9, %p4334_p0  ;;  %p4386_p12 = scmp.lt.s32.totalorder %s4384_s18, %s4377_s12 }
  0x63   : > { %p4381_p5 = pneg %p4380_p2  ;;  %p4387_p6 = por %p4386_p12, %p4385_p1 }
  0x65   : > { %p4388_p8 = pnand %p4387_p6, %p4381_p5 }
  0x67   : > { %4391 = shalt.err (!%p4388_p8)
}
  0x68   : > { %4257 = dma.hbm_to_vmem [thread:$0]  (!%p4615_p11), %s4624_s17, 64, %s233_s24, %s222_s30  }
  0x69   : > { %p6037_p4 = scmp.ne.s32.totalorder %s6031_s27, 0 }
  0x6b   : > { %241 = sbr.rel (%p6037_p4) target bundleno = 712 (0x2c8), region = 40 }
  0x72   : > { %s4675_s16 = sand.u32 1, %s4458_s21   ;;  %p6038_p0 = scmp.ne.s32.totalorder %s6029_s25, 0 }
  0x73   : > { %s2729_s19 = sshll.u32 %s4675_s16, 2  ;;  %s244_s13 = scalar_lea.sflag [#allocation4], %s4675_s16 }
  0x74   : > { %s247_s7 = scalar_lea.vmem [#allocation3], %s2729_s19 }
  0x75   : > { %4437 = dma.done.wait (%p6038_p0), %s244_s13, 64  }
  0x76   : > { %4439 = vsyncadd (%p6038_p0), %s244_s13, 4294967232  ;;  %s252_s14 = sand.u32 1, %s4531_s4   ;;  %s256_s27 = scalar_lea.vmem [#allocation6], %s2729_s19 }
  0x77   : > { %s253_s17 = scalar_lea.sflag [#allocation7], %s252_s14 }
  0x78   : > { %4441 = dma.done.wait (%p6038_p0), %s253_s17, 64  }
  0x79   : > { %4443 = vsyncadd (%p6038_p0), %s253_s17, 4294967232  ;;  %p6039_p12 = scmp.eq.s32.totalorder %s4531_s4, 0 }
  0x7b   : > { %4445 = dma.done.wait (%p6039_p12), [#allocation7], 256   ;;  %p6040_p11 = pmov %p6039_p12 }
  0x7c   : > { %v291_v0 = vlaneseq  ;;  %v4720_v12 = vld [vmem:[%s256_s27] ss:$0 sm:$0xff]  ;;  %v4722_v13 = vld [vmem:[%s256_s27 + $0x1] ss:$0 sm:$0xff]  ;;  %v4730_v16 = vld [vmem:[%s247_s7] ss:$0 sm:$0xff] }
  0x7d   : > { %4447 = vsyncadd (%p6040_p11), [#allocation7], 4294967040  ;;  %v4732_v17 = vld [vmem:[%s247_s7 + $0x1] ss:$0 sm:$0xff]  ;;  %v4734_v18 = vld [vmem:[%s247_s7 + $0x2] ss:$0 sm:$0xff] }
  0x7e   : > { %v4692_v1 = vshrl.u32 %v291_v0, 7  ;;  %v4736_v19 = vld [vmem:[%s256_s27 + $0x2] ss:$0 sm:$0xff]  ;;  %s2605_s30 = sld [smem:[#allocation2]]  ;;  %s2738_s10 = sshll.u32 %s4531_s4, 4 }
  0x7f   : > { %s290_s11 = scalar_lea.vmem [#allocation9], %s4675_s16  ;;  %s5882_s29 = scalar_lea.hbm %s5931_s5, %s2738_s10 }
  0x80   : > { %v293_v2 = vadd.s32 8, %v4692_v1  ;;  %v294_v3 = vadd.s32 16, %v4692_v1  ;;  %v4697_v4 = vadd.s32 24, %v4692_v1  ;;  %v4700_v5 = vadd.s32 32, %v4692_v1  ;;  %s2622_s15 = sshll.u32 %s290_s11, 4  ;;  %s2610_s8 = scalar_lea.sflag [#allocation5], %s4675_s16  ;;  %s5884_s15 = int_to_ptr.vmem [resolvable:$true] %s2622_s15 }
  0x81   : > { %v4703_v6 = vadd.s32 40, %v4692_v1  ;;  %v4706_v7 = vadd.s32 48, %v4692_v1  ;;  %v4709_v8 = vadd.s32 56, %v4692_v1  ;;  %v4712_v9 = vadd.s32 64, %v4692_v1  ;;  %s4392_s18 = scalar_lea.vmem %s5884_s15, 16  ;;  %p6153_p13 = scmp.ne.s32.totalorder %s6035_s9, 0 }
  0x82   : > { %v4715_v10 = vadd.s32 72, %v4692_v1  ;;  %v4718_v11 = vadd.s32 80, %v4692_v1  ;;  %v4725_v14 = vadd.s32 88, %v4692_v1  ;;  %v4728_v15 = vadd.s32 96, %v4692_v1  ;;  %p4393_p10 = scmp.ne.s32.totalorder %s5884_s15, %s4392_s18  ;;  %s4476_s4 = smov [#allocation9]  }
  0x83   : > { %vm314_vm0 = vcmp.eq.s32.totalorder %v4730_v16, %v4692_v1  ;;  %vm315_vm1 = vcmp.eq.s32.totalorder %v4730_v16, %v293_v2  ;;  %vm404_vm2 = vcmp.eq.s32.totalorder %v4732_v17, %v4692_v1  ;;  %vm405_vm3 = vcmp.eq.s32.totalorder %v4732_v17, %v293_v2  ;;  %s4396_s19 = sshll.u32 %s4476_s4, 4  ;;  %s4397_s19 = int_to_ptr.vmem [resolvable:$false] %s4396_s19 }
  0x84   : > { %v334_v20 = vsel %vm314_vm0, %v4720_v12, 0.0  ;;  %v335_v21 = vsel %vm315_vm1, %v4720_v12, 0.0  ;;  %v424_v22 = vsel %vm404_vm2, %v4722_v13, 0.0  ;;  %v425_v23 = vsel %vm405_vm3, %v4722_v13, 0.0  ;;  %p4394_p3 = pnand %p4393_p10, %p6153_p13  ;;  %s4398_s13 = scalar_lea.vmem %s4397_s19, 32 }
  0x85   : > { %v440_v24 = vadd.f32 %v424_v22, %v334_v20  ;;  %v441_v25 = vadd.f32 %v425_v23, %v335_v21  ;;  %vm494_vm4 = vcmp.eq.s32.totalorder %v4734_v18, %v4692_v1  ;;  %vm495_vm5 = vcmp.eq.s32.totalorder %v4734_v18, %v293_v2  ;;  %p4399_p9 = scmp.lt.s32.totalorder %s5884_s15, %s4397_s19  ;;  %p4400_p2 = scmp.lt.s32.totalorder %s4398_s13, %s4392_s18 }
  0x86   : > { %v514_v26 = vsel %vm494_vm4, %v4736_v19, 0.0  ;;  %v515_v27 = vsel %vm495_vm5, %v4736_v19, 0.0  ;;  %v366_v28 = vmul.f32 %v4720_v12, %v334_v20  ;;  %v367_v29 = vmul.f32 %v4720_v12, %v335_v21  ;;  %p4395_p7 = pneg %p4394_p3 }
  0x87   : > { %v4755_v30 = vadd.f32 %v514_v26, %v440_v24  ;;  %v4757_v31 = vadd.f32 %v515_v27, %v441_v25  ;;  %v456_v32 = vmul.f32 %v4722_v13, %v424_v22  ;;  %v457_v33 = vmul.f32 %v4722_v13, %v425_v23  ;;  %p4401_p5 = por %p4400_p2, %p4399_p9 }
  0x88   : > { %v546_v34 = vmul.f32 %v4736_v19, %v514_v26  ;;  %v547_v35 = vmul.f32 %v4736_v19, %v515_v27  ;;  %vm316_vm6 = vcmp.eq.s32.totalorder %v4730_v16, %v294_v3  ;;  %vm317_vm7 = vcmp.eq.s32.totalorder %v4730_v16, %v4697_v4 }
  0x89   : > { %v5961_v36 = vand.u32 4294901760, %v4755_v30  ;;  %v5960_v37 = vand.u32 4294901760, %v4757_v31  ;;  %v472_v38 = vadd.f32 %v456_v32, %v366_v28  ;;  %v473_v39 = vadd.f32 %v457_v33, %v367_v29  ;;  %p4402_p1 = pnand %p4401_p5, %p4395_p7 }
  0x8a   : > { %v336_v40 = vsel %vm316_vm6, %v4720_v12, 0.0  ;;  %v337_v41 = vsel %vm317_vm7, %v4720_v12, 0.0  ;;  %vm406_vm8 = vcmp.eq.s32.totalorder %v4732_v17, %v294_v3  ;;  %vm407_vm9 = vcmp.eq.s32.totalorder %v4732_v17, %v4697_v4 }
  0x8b   : > { %v4777_v42 = vpack.c.bf16 %v5960_v37, %v5961_v36  ;;  %v4779_v43 = vadd.f32 %v546_v34, %v472_v38  ;;  %v4781_v44 = vadd.f32 %v547_v35, %v473_v39  ;;  %v426_v45 = vsel %vm406_vm8, %v4722_v13, 0.0 }
  0x8c   : > { %v427_v46 = vsel %vm407_vm9, %v4722_v13, 0.0  ;;  %v442_v47 = vadd.f32 %v426_v45, %v336_v40  ;;  %vm496_vm10 = vcmp.eq.s32.totalorder %v4734_v18, %v294_v3  ;;  %vm497_vm11 = vcmp.eq.s32.totalorder %v4734_v18, %v4697_v4 }
  0x8d   : > { %3690 = vmatprep.subr.bf16.mxu0 %v4777_v42  ;;  %v5959_v48 = vand.u32 4294901760, %v4779_v43  ;;  %v5954_v49 = vand.u32 4294901760, %v4781_v44  ;;  %v443_v50 = vadd.f32 %v427_v46, %v337_v41  ;;  %v516_v51 = vsel %vm496_vm10, %v4736_v19, 0.0 }
  0x8e   : > { %3692 = vmatpush3.bf16.msra.mxu0 %v4777_v42  ;;  %v517_v52 = vsel %vm497_vm11, %v4736_v19, 0.0  ;;  %v4794_v53 = vadd.f32 %v516_v51, %v442_v47  ;;  %v368_v54 = vmul.f32 %v4720_v12, %v336_v40  ;;  %v369_v55 = vmul.f32 %v4720_v12, %v337_v41 }
  0x8f   : > { %v4802_v56 = vpack.c.bf16 %v5954_v49, %v5959_v48  ;;  %v4804_v57 = vadd.f32 %v517_v52, %v443_v50  ;;  %v458_v58 = vmul.f32 %v4722_v13, %v426_v45  ;;  %v459_v59 = vmul.f32 %v4722_v13, %v427_v46 }
  0x90   : > { %v5953_v60 = vand.u32 4294901760, %v4794_v53  ;;  %v548_v61 = vmul.f32 %v4736_v19, %v516_v51  ;;  %v549_v62 = vmul.f32 %v4736_v19, %v517_v52  ;;  %vm318_vm12 = vcmp.eq.s32.totalorder %v4730_v16, %v4700_v5 }
  0x91   : > { %3882 = vmatprep.subr.bf16.mxu1 %v4802_v56  ;;  %v5952_v63 = vand.u32 4294901760, %v4804_v57  ;;  %v474_v0 = vadd.f32 %v458_v58, %v368_v54  ;;  %v475_v2 = vadd.f32 %v459_v59, %v369_v55  ;;  %vm319_vm13 = vcmp.eq.s32.totalorder %v4730_v16, %v4703_v6 }
  0x92   : > { %3884 = vmatpush3.bf16.msra.mxu1 %v4802_v56  ;;  %v338_v3 = vsel %vm318_vm12, %v4720_v12, 0.0  ;;  %v339_v4 = vsel %vm319_vm13, %v4720_v12, 0.0  ;;  %vm408_vm14 = vcmp.eq.s32.totalorder %v4732_v17, %v4700_v5  ;;  %vm409_vm15 = vcmp.eq.s32.totalorder %v4732_v17, %v4703_v6 }
  0x93   : > { %v4828_v20 = vpack.c.bf16 %v5952_v63, %v5953_v60  ;;  %v4830_v21 = vadd.f32 %v548_v61, %v474_v0  ;;  %v4832_v22 = vadd.f32 %v549_v62, %v475_v2  ;;  %v428_v23 = vsel %vm408_vm14, %v4722_v13, 0.0 }
  0x94   : > { %v429_v24 = vsel %vm409_vm15, %v4722_v13, 0.0  ;;  %v444_v25 = vadd.f32 %v428_v23, %v338_v3  ;;  %vm498_vm0 = vcmp.eq.s32.totalorder %v4734_v18, %v4700_v5  ;;  %vm499_vm1 = vcmp.eq.s32.totalorder %v4734_v18, %v4703_v6 }
  0x95   : > { %3694 = vmatprep.subr.bf16.mxu0 %v4828_v20  ;;  %v5951_v26 = vand.u32 4294901760, %v4830_v21  ;;  %v5950_v27 = vand.u32 4294901760, %v4832_v22  ;;  %v445_v28 = vadd.f32 %v429_v24, %v339_v4  ;;  %v518_v29 = vsel %vm498_vm0, %v4736_v19, 0.0 }
  0x96   : > { %3696 = vmatpush3.bf16.msra.mxu0 %v4828_v20  ;;  %v519_v32 = vsel %vm499_vm1, %v4736_v19, 0.0  ;;  %v4846_v33 = vadd.f32 %v518_v29, %v444_v25  ;;  %v370_v5 = vmul.f32 %v4720_v12, %v338_v3  ;;  %v371_v34 = vmul.f32 %v4720_v12, %v339_v4 }
  0x97   : > { %v4854_v6 = vpack.c.bf16 %v5950_v27, %v5951_v26  ;;  %v4856_v35 = vadd.f32 %v519_v32, %v445_v28  ;;  %v460_v38 = vmul.f32 %v4722_v13, %v428_v23  ;;  %v461_v39 = vmul.f32 %v4722_v13, %v429_v24 }
  0x98   : > { %v5945_v40 = vand.u32 4294901760, %v4846_v33  ;;  %v550_v41 = vmul.f32 %v4736_v19, %v518_v29  ;;  %v551_v45 = vmul.f32 %v4736_v19, %v519_v32  ;;  %vm320_vm2 = vcmp.eq.s32.totalorder %v4730_v16, %v4706_v7 }
  0x99   : > { %3886 = vmatprep.subr.bf16.mxu1 %v4854_v6  ;;  %v5944_v46 = vand.u32 4294901760, %v4856_v35  ;;  %v476_v47 = vadd.f32 %v460_v38, %v370_v5  ;;  %v477_v50 = vadd.f32 %v461_v39, %v371_v34  ;;  %vm321_vm3 = vcmp.eq.s32.totalorder %v4730_v16, %v4709_v8 }
  0x9a   : > { %3888 = vmatpush3.bf16.msra.mxu1 %v4854_v6  ;;  %v340_v51 = vsel %vm320_vm2, %v4720_v12, 0.0  ;;  %v341_v52 = vsel %vm321_vm3, %v4720_v12, 0.0  ;;  %vm410_vm4 = vcmp.eq.s32.totalorder %v4732_v17, %v4706_v7  ;;  %vm411_vm5 = vcmp.eq.s32.totalorder %v4732_v17, %v4709_v8 }
  0x9b   : > { %v4880_v54 = vpack.c.bf16 %v5944_v46, %v5945_v40  ;;  %v4882_v55 = vadd.f32 %v550_v41, %v476_v47  ;;  %v4884_v58 = vadd.f32 %v551_v45, %v477_v50  ;;  %v430_v59 = vsel %vm410_vm4, %v4722_v13, 0.0 }
  0x9c   : > { %v431_v61 = vsel %vm411_vm5, %v4722_v13, 0.0  ;;  %v446_v62 = vadd.f32 %v430_v59, %v340_v51  ;;  %vm500_vm6 = vcmp.eq.s32.totalorder %v4734_v18, %v4706_v7  ;;  %vm501_vm7 = vcmp.eq.s32.totalorder %v4734_v18, %v4709_v8 }
  0x9d   : > { %3698 = vmatprep.subr.bf16.mxu0 %v4880_v54  ;;  %v5943_v0 = vand.u32 4294901760, %v4882_v55  ;;  %v5942_v2 = vand.u32 4294901760, %v4884_v58  ;;  %v447_v3 = vadd.f32 %v431_v61, %v341_v52  ;;  %v520_v4 = vsel %vm500_vm6, %v4736_v19, 0.0 }
  0x9e   : > { %3700 = vmatpush3.bf16.msra.mxu0 %v4880_v54  ;;  %v521_v23 = vsel %vm501_vm7, %v4736_v19, 0.0  ;;  %v4898_v24 = vadd.f32 %v520_v4, %v446_v62  ;;  %v372_v7 = vmul.f32 %v4720_v12, %v340_v51  ;;  %v373_v25 = vmul.f32 %v4720_v12, %v341_v52 }
  0x9f   : > { %v4906_v8 = vpack.c.bf16 %v5942_v2, %v5943_v0  ;;  %v4908_v28 = vadd.f32 %v521_v23, %v447_v3  ;;  %v462_v29 = vmul.f32 %v4722_v13, %v430_v59  ;;  %v463_v32 = vmul.f32 %v4722_v13, %v431_v61 }
  0xa0   : > { %v5941_v5 = vand.u32 4294901760, %v4898_v24  ;;  %v552_v34 = vmul.f32 %v4736_v19, %v520_v4  ;;  %v553_v38 = vmul.f32 %v4736_v19, %v521_v23  ;;  %vm322_vm8 = vcmp.eq.s32.totalorder %v4730_v16, %v4712_v9 }
  0xa1   : > { %3890 = vmatprep.subr.bf16.mxu1 %v4906_v8  ;;  %v5936_v39 = vand.u32 4294901760, %v4908_v28  ;;  %v478_v41 = vadd.f32 %v462_v29, %v372_v7  ;;  %v479_v45 = vadd.f32 %v463_v32, %v373_v25  ;;  %vm323_vm9 = vcmp.eq.s32.totalorder %v4730_v16, %v4715_v10 }
  0xa2   : > { %3892 = vmatpush3.bf16.msra.mxu1 %v4906_v8  ;;  %v342_v47 = vsel %vm322_vm8, %v4720_v12, 0.0  ;;  %v343_v50 = vsel %vm323_vm9, %v4720_v12, 0.0  ;;  %vm412_vm10 = vcmp.eq.s32.totalorder %v4732_v17, %v4712_v9  ;;  %vm413_vm11 = vcmp.eq.s32.totalorder %v4732_v17, %v4715_v10 }
  0xa3   : > { %v4932_v51 = vpack.c.bf16 %v5936_v39, %v5941_v5  ;;  %v4934_v52 = vadd.f32 %v552_v34, %v478_v41  ;;  %v4936_v59 = vadd.f32 %v553_v38, %v479_v45  ;;  %v432_v61 = vsel %vm412_vm10, %v4722_v13, 0.0 }
  0xa4   : > { %v433_v62 = vsel %vm413_vm11, %v4722_v13, 0.0  ;;  %v448_v3 = vadd.f32 %v432_v61, %v342_v47  ;;  %vm502_vm12 = vcmp.eq.s32.totalorder %v4734_v18, %v4712_v9  ;;  %vm503_vm13 = vcmp.eq.s32.totalorder %v4734_v18, %v4715_v10 }
  0xa5   : > { %6041 = vst [vmem:[#allocation14_spill] sm:$0xff] %v4932_v51  ;;  %3702 = vmatprep.subr.bf16.mxu0 %v4932_v51  ;;  %v5940_v4 = vand.u32 4294901760, %v4934_v52  ;;  %v5937_v23 = vand.u32 4294901760, %v4936_v59  ;;  %v449_v7 = vadd.f32 %v433_v62, %v343_v50  ;;  %v522_v25 = vsel %vm502_vm12, %v4736_v19, 0.0 }
  0xa6   : > { %3704 = vmatpush3.bf16.msra.mxu0 %v4932_v51  ;;  %v523_v29 = vsel %vm503_vm13, %v4736_v19, 0.0  ;;  %v4950_v32 = vadd.f32 %v522_v25, %v448_v3  ;;  %v374_v9 = vmul.f32 %v4720_v12, %v342_v47  ;;  %v375_v34 = vmul.f32 %v4720_v12, %v343_v50 }
  0xa7   : > { %v4958_v10 = vpack.c.bf16 %v5937_v23, %v5940_v4  ;;  %v4960_v38 = vadd.f32 %v523_v29, %v449_v7  ;;  %v464_v41 = vmul.f32 %v4722_v13, %v432_v61  ;;  %v465_v45 = vmul.f32 %v4722_v13, %v433_v62 }
  0xa8   : > { %v5939_v39 = vand.u32 4294901760, %v4950_v32  ;;  %v554_v3 = vmul.f32 %v4736_v19, %v522_v25  ;;  %v555_v47 = vmul.f32 %v4736_v19, %v523_v29  ;;  %vm324_vm14 = vcmp.eq.s32.totalorder %v4730_v16, %v4718_v11 }
  0xa9   : > { %6042 = vst [vmem:[#allocation15_spill] sm:$0xff] %v4958_v10  ;;  %3894 = vmatprep.subr.bf16.mxu1 %v4958_v10  ;;  %v5938_v50 = vand.u32 4294901760, %v4960_v38  ;;  %v480_v23 = vadd.f32 %v464_v41, %v374_v9  ;;  %v481_v7 = vadd.f32 %v465_v45, %v375_v34  ;;  %vm325_vm15 = vcmp.eq.s32.totalorder %v4730_v16, %v4725_v14 }
  0xaa   : > { %3896 = vmatpush3.bf16.msra.mxu1 %v4958_v10  ;;  %v344_v61 = vsel %vm324_vm14, %v4720_v12, 0.0  ;;  %v345_v62 = vsel %vm325_vm15, %v4720_v12, 0.0  ;;  %vm414_vm0 = vcmp.eq.s32.totalorder %v4732_v17, %v4718_v11  ;;  %vm415_vm1 = vcmp.eq.s32.totalorder %v4732_v17, %v4725_v14 }
  0xab   : > { %v4984_v25 = vpack.c.bf16 %v5938_v50, %v5939_v39  ;;  %v4986_v29 = vadd.f32 %v554_v3, %v480_v23  ;;  %v4988_v9 = vadd.f32 %v555_v47, %v481_v7  ;;  %v434_v34 = vsel %vm414_vm0, %v4722_v13, 0.0 }
  0xac   : > { %v435_v41 = vsel %vm415_vm1, %v4722_v13, 0.0  ;;  %v450_v45 = vadd.f32 %v434_v34, %v344_v61  ;;  %vm504_vm2 = vcmp.eq.s32.totalorder %v4734_v18, %v4718_v11  ;;  %vm505_vm3 = vcmp.eq.s32.totalorder %v4734_v18, %v4725_v14 }
  0xad   : > { %6043 = vst [vmem:[#allocation16_spill] sm:$0xff] %v4984_v25  ;;  %3706 = vmatprep.subr.bf16.mxu0 %v4984_v25  ;;  %v5947_v50 = vand.u32 4294901760, %v4986_v29  ;;  %v5946_v23 = vand.u32 4294901760, %v4988_v9  ;;  %v451_v3 = vadd.f32 %v435_v41, %v345_v62  ;;  %v524_v47 = vsel %vm504_vm2, %v4736_v19, 0.0 }
  0xae   : > { %3708 = vmatpush3.bf16.msra.mxu0 %v4984_v25  ;;  %v525_v7 = vsel %vm505_vm3, %v4736_v19, 0.0  ;;  %v5002_v39 = vadd.f32 %v524_v47, %v450_v45  ;;  %v376_v11 = vmul.f32 %v4720_v12, %v344_v61  ;;  %v377_v4 = vmul.f32 %v4720_v12, %v345_v62 }
  0xaf   : > { %v5010_v14 = vpack.c.bf16 %v5946_v23, %v5947_v50  ;;  %v5012_v5 = vadd.f32 %v525_v7, %v451_v3  ;;  %v466_v2 = vmul.f32 %v4722_v13, %v434_v34  ;;  %v467_v0 = vmul.f32 %v4722_v13, %v435_v41 }
  0xb0   : > { %v5949_v46 = vand.u32 4294901760, %v5002_v39  ;;  %v556_v45 = vmul.f32 %v4736_v19, %v524_v47  ;;  %v557_v61 = vmul.f32 %v4736_v19, %v525_v7  ;;  %v305_v62 = vadd.s32 104, %v4692_v1 }
  0xb1   : > { %6044 = vst [vmem:[#allocation17_spill] sm:$0xff] %v5010_v14  ;;  %3898 = vmatprep.subr.bf16.mxu1 %v5010_v14  ;;  %v5948_v40 = vand.u32 4294901760, %v5012_v5  ;;  %v482_v23 = vadd.f32 %v466_v2, %v376_v11  ;;  %v483_v50 = vadd.f32 %v467_v0, %v377_v4  ;;  %vm326_vm4 = vcmp.eq.s32.totalorder %v4730_v16, %v4728_v15 }
  0xb2   : > { %3900 = vmatpush3.bf16.msra.mxu1 %v5010_v14  ;;  %vm327_vm5 = vcmp.eq.s32.totalorder %v4730_v16, %v305_v62  ;;  %v346_v34 = vsel %vm326_vm4, %v4720_v12, 0.0  ;;  %vm416_vm6 = vcmp.eq.s32.totalorder %v4732_v17, %v4728_v15  ;;  %vm417_vm7 = vcmp.eq.s32.totalorder %v4732_v17, %v305_v62 }
  0xb3   : > { %v5034_v2 = vpack.c.bf16 %v5948_v40, %v5949_v46  ;;  %v5036_v0 = vadd.f32 %v556_v45, %v482_v23  ;;  %v5038_v4 = vadd.f32 %v557_v61, %v483_v50  ;;  %v347_v41 = vsel %vm327_vm5, %v4720_v12, 0.0 }
  0xb4   : > { %v436_v3 = vsel %vm416_vm6, %v4722_v13, 0.0  ;;  %v437_v47 = vsel %vm417_vm7, %v4722_v13, 0.0  ;;  %vm506_vm8 = vcmp.eq.s32.totalorder %v4734_v18, %v4728_v15  ;;  %vm507_vm9 = vcmp.eq.s32.totalorder %v4734_v18, %v305_v62 }
  0xb5   : > { %6045 = vst [vmem:[#allocation18_spill] sm:$0xff] %v5034_v2  ;;  %3710 = vmatprep.subr.bf16.mxu0 %v5034_v2  ;;  %v5958_v7 = vand.u32 4294901760, %v5036_v0  ;;  %v5955_v23 = vand.u32 4294901760, %v5038_v4  ;;  %v452_v11 = vadd.f32 %v436_v3, %v346_v34  ;;  %v453_v50 = vadd.f32 %v437_v47, %v347_v41 }
  0xb6   : > { %3712 = vmatpush3.bf16.msra.mxu0 %v5034_v2  ;;  %v526_v45 = vsel %vm506_vm8, %v4736_v19, 0.0  ;;  %v527_v61 = vsel %vm507_vm9, %v4736_v19, 0.0  ;;  %v378_v40 = vmul.f32 %v4720_v12, %v346_v34  ;;  %v379_v15 = vmul.f32 %v4720_v12, %v347_v41 }
  0xb7   : > { %v5058_v62 = vpack.c.bf16 %v5955_v23, %v5958_v7  ;;  %v5060_v46 = vadd.f32 %v526_v45, %v452_v11  ;;  %v5062_v27 = vadd.f32 %v527_v61, %v453_v50  ;;  %v468_v26 = vmul.f32 %v4722_v13, %v436_v3 }
  0xb8   : > { %v469_v63 = vmul.f32 %v4722_v13, %v437_v47  ;;  %v558_v60 = vmul.f32 %v4736_v19, %v526_v45  ;;  %v559_v34 = vmul.f32 %v4736_v19, %v527_v61  ;;  %v306_v41 = vadd.s32 112, %v4692_v1 }
  0xb9   : > { %6046 = vst [vmem:[#allocation19_spill] sm:$0xff] %v5058_v62  ;;  %3902 = vmatprep.subr.bf16.mxu1 %v5058_v62  ;;  %v5957_v49 = vand.u32 4294901760, %v5060_v46  ;;  %v5956_v23 = vand.u32 4294901760, %v5062_v27  ;;  %v484_v11 = vadd.f32 %v468_v26, %v378_v40  ;;  %v307_v50 = vadd.s32 120, %v4692_v1 }
  0xba   : > { %3904 = vmatpush3.bf16.msra.mxu1 %v5058_v62  ;;  %v485_v3 = vadd.f32 %v469_v63, %v379_v15  ;;  %vm328_vm10 = vcmp.eq.s32.totalorder %v4730_v16, %v306_v41  ;;  %vm418_vm11 = vcmp.eq.s32.totalorder %v4732_v17, %v306_v41  ;;  %vm508_vm12 = vcmp.eq.s32.totalorder %v4734_v18, %v306_v41 }
  0xbb   : > { %v5081_v47 = vpack.c.bf16 %v5956_v23, %v5957_v49  ;;  %v5083_v45 = vadd.f32 %v558_v60, %v484_v11  ;;  %vm329_vm13 = vcmp.eq.s32.totalorder %v4730_v16, %v307_v50  ;;  %v348_v1 = vsel %vm328_vm10, %v4720_v12, 0.0 }
  0xbc   : > { %v5087_v26 = vadd.f32 %v559_v34, %v485_v3  ;;  %v349_v63 = vsel %vm329_vm13, %v4720_v12, 0.0  ;;  %vm419_vm14 = vcmp.eq.s32.totalorder %v4732_v17, %v307_v50  ;;  %v438_v40 = vsel %vm418_vm11, %v4722_v13, 0.0  ;;  %v578_v3 = vld [vmem:[#allocation8] sm:$0xff] }
  0xbd   : > { %6047 = vst [vmem:[#allocation20_spill] sm:$0xff] %v5081_v47  ;;  %3714 = vmatprep.subr.bf16.mxu0 %v5081_v47  ;;  %v5963_v61 = vand.u32 4294901760, %v5083_v45  ;;  %v439_v15 = vsel %vm419_vm14, %v4722_v13, 0.0  ;;  %v454_v60 = vadd.f32 %v438_v40, %v348_v1  ;;  %vm509_vm15 = vcmp.eq.s32.totalorder %v4734_v18, %v307_v50 }
  0xbe   : > { %3716 = vmatpush3.bf16.msra.mxu0 %v5081_v47  ;;  %v5962_v16 = vand.u32 4294901760, %v5087_v26  ;;  %v455_v34 = vadd.f32 %v439_v15, %v349_v63  ;;  %v528_v17 = vsel %vm508_vm12, %v4736_v19, 0.0  ;;  %v529_v11 = vsel %vm509_vm15, %v4736_v19, 0.0 }
  0xbf   : > { %v5102_v23 = vadd.f32 %v528_v17, %v454_v60  ;;  %v380_v49 = vmul.f32 %v4720_v12, %v348_v1  ;;  %v381_v7 = vmul.f32 %v4720_v12, %v349_v63  ;;  %v470_v50 = vmul.f32 %v4722_v13, %v438_v40  ;;  %v579_v60 = vld [vmem:[#allocation8 + $0x8] sm:$0xff] }
  0xc0   : > { %v5111_v48 = vpack.c.bf16 %v5962_v16, %v5963_v61  ;;  %v5113_v37 = vadd.f32 %v529_v11, %v455_v34  ;;  %v471_v18 = vmul.f32 %v4722_v13, %v439_v15  ;;  %v560_v41 = vmul.f32 %v4736_v19, %v528_v17 }
  0xc1   : > { %v5965_v36 = vand.u32 4294901760, %v5102_v23  ;;  %v486_v1 = vadd.f32 %v470_v50, %v380_v49  ;;  %v561_v12 = vmul.f32 %v4736_v19, %v529_v11  ;;  %v5119_v63 = vand.u32 4294901760, %v578_v3 }
  0xc2   : > { %6048 = vst [vmem:[#allocation21_spill] sm:$0xff] %v5111_v48  ;;  %3906 = vmatprep.subr.bf16.mxu1 %v5111_v48  ;;  %v5964_v40 = vand.u32 4294901760, %v5113_v37  ;;  %v487_v16 = vadd.f32 %v471_v18, %v381_v7  ;;  %v6050_v34 = vand.u32 4294901760, %v4755_v30  ;;  %v6051_v13 = vand.u32 4294901760, %v4757_v31 }
  0xc3   : > { %6049 = vst [vmem:[#allocation22_spill] sm:$0xff] %v5119_v63  ;;  %3908 = vmatpush3.bf16.msra.mxu1 %v5111_v48  ;;  %v5134_v19 = vadd.f32 %v560_v41, %v486_v1  ;;  %v5137_v49 = vsub.f32 %v578_v3, %v5119_v63  ;;  %v5139_v17 = vand.u32 4294901760, %v579_v60  ;;  %v1264_v7 = vmul.f32 %v578_v3, %v578_v3 }
  0xc4   : > { %v5126_v61 = vsub.f32 %v4755_v30, %v6050_v34  ;;  %v5131_v15 = vsub.f32 %v4757_v31, %v6051_v13  ;;  %v5145_v30 = vpack.c.bf16 %v5964_v40, %v5965_v36  ;;  %v5147_v11 = vadd.f32 %v561_v12, %v487_v16 }
  0xc5   : > { %v5974_v41 = vand.u32 4294901760, %v5137_v49  ;;  %v5154_v1 = vsub.f32 %v579_v60, %v5139_v17  ;;  %v5156_v3 = vand.u32 4294901760, %v1264_v7  ;;  %v6054_v13 = vand.u32 4294901760, %v4779_v43 }
  0xc6   : > { %6052 = vst [vmem:[#allocation23_spill] sm:$0xff] %v5145_v30  ;;  %v5966_v31 = vand.u32 4294901760, %v5126_v61  ;;  %v5967_v50 = vand.u32 4294901760, %v5131_v15  ;;  %3718 = vmatprep.subr.bf16.mxu0 %v5145_v30  ;;  %v6056_v48 = vand.u32 4294901760, %v5134_v19  ;;  %vm4474_vm0 = vmmov 0  }
  0xc7   : > { %6053 = vst [vmem:[#allocation24_spill] sm:$0xff] %v5156_v3  ;;  %v5169_v40 = vsub.f32 %v4779_v43, %v6054_v13  ;;  %3720 = vmatpush3.bf16.msra.mxu0 %v5145_v30  ;;  %v664_v36 = vsub.f32 %v5137_v49, %v5974_v41  ;;  %v5979_v34 = vand.u32 4294901760, %v5154_v1  ;;  %v5177_v18 = vsub.f32 %v1264_v7, %v5156_v3 }
  0xc8   : > { %v685_v16 = vsub.f32 %v5126_v61, %v5966_v31  ;;  %v692_v12 = vsub.f32 %v5131_v15, %v5967_v50  ;;  %v6055_v31 = vand.u32 4294901760, %v4781_v44  ;;  %v6057_v43 = vand.u32 4294901760, %v5147_v11 }
  0xc9   : > { %v5981_v41 = vand.u32 4294901760, %v5169_v40  ;;  %v665_v62 = vand.u32 4294901760, %v664_v36  ;;  %v674_v7 = vsub.f32 %v5154_v1, %v5979_v34  ;;  %v5980_v2 = vand.u32 4294901760, %v5177_v18 }
  0xca   : > { %v5182_v50 = vsub.f32 %v4781_v44, %v6055_v31  ;;  %v5188_v13 = vpack.c.bf16 %v6057_v43, %v6056_v48  ;;  %v686_v30 = vand.u32 4294901760, %v685_v16  ;;  %v693_v47 = vand.u32 4294901760, %v692_v12 }
  0xcb   : > { %v1371_v48 = vsub.f32 %v5169_v40, %v5981_v41  ;;  %v1265_v16 = vmul.f32 %v579_v60, %v579_v60  ;;  %v6060_v12 = vand.u32 4294901760, %v4794_v53  ;;  %3091 = vmatprep.mubr.f32.mxu0 %v665_v62  ;;  %v675_v43 = vand.u32 4294901760, %v674_v7 }
  0xcc   : > { %6058 = vst [vmem:[#allocation25_spill] sm:$0xff] %v5188_v13  ;;  %v5982_v44 = vand.u32 4294901760, %v5182_v50  ;;  %3910 = vmatprep.subr.bf16.mxu1 %v5188_v13  ;;  %v5197_v31 = vpack.c.bf16 %v693_v47, %v686_v30  ;;  %v1350_v34 = vsub.f32 %v5177_v18, %v5980_v2  ;;  %v6061_v30 = vand.u32 4294901760, %v4804_v57 }
  0xcd   : > { %v5205_v36 = vsub.f32 %v4794_v53, %v6060_v12  ;;  %3912 = vmatpush3.bf16.msra.mxu1 %v5188_v13  ;;  %v1372_v53 = vand.u32 4294901760, %v1371_v48  ;;  %v5220_v12 = vand.u32 4294901760, %v1265_v16  ;;  %v6062_v7 = vand.u32 4294901760, %v4830_v21  ;;  %3092 = vmatmul.mubr.f32.vlgmr.msra.gmra.mrb[0].mxu0 %v675_v43 }
  0xce   : > { %6059 = vst [vmem:[#allocation26_spill] sm:$0xff] %v5197_v31  ;;  %v1378_v47 = vsub.f32 %v5182_v50, %v5982_v44  ;;  %v5217_v60 = vsub.f32 %v4804_v57, %v6061_v30  ;;  %3722 = vmatprep.subr.bf16.mxu0 %v5197_v31  ;;  %v1351_v41 = vand.u32 4294901760, %v1350_v34  ;;  %v6063_v57 = vand.u32 4294901760, %v4832_v22  ;;  %3126 = vmatprep.mubr.f32.mxu0 %v5119_v63 }
  0xcf   : > { %v5985_v62 = vand.u32 4294901760, %v5205_v36  ;;  %v5226_v2 = vsub.f32 %v4830_v21, %v6062_v7  ;;  %3724 = vmatpush3.bf16.msra.mxu0 %v5197_v31  ;;  %v5236_v48 = vsub.f32 %v1265_v16, %v5220_v12  ;;  %v6064_v34 = vand.u32 4294901760, %v4846_v33 }
  0xd0   : > { %v1379_v44 = vand.u32 4294901760, %v1378_v47  ;;  %v5987_v13 = vand.u32 4294901760, %v5217_v60  ;;  %v5232_v30 = vsub.f32 %v4832_v22, %v6063_v57  ;;  %3301 = vmatprep.mubr.f32.mxu1 %v1351_v41  ;;  %v6065_v57 = vand.u32 4294901760, %v4856_v35 }
  0xd1   : > { %v699_v21 = vsub.f32 %v5205_v36, %v5985_v62  ;;  %v5245_v47 = vsub.f32 %v4846_v33, %v6064_v34  ;;  %v5995_v43 = vand.u32 4294901760, %v5236_v48  ;;  %v6066_v33 = vand.u32 4294901760, %v5226_v2 }
  0xd2   : > { %v3913_v22 = vpack.c.bf16 %v1379_v44, %v1372_v53  ;;  %v706_v16 = vsub.f32 %v5217_v60, %v5987_v13  ;;  %v5990_v7 = vand.u32 4294901760, %v5232_v30  ;;  %v5255_v62 = vsub.f32 %v4856_v35, %v6065_v57 }
  0xd3   : > { %v700_v31 = vand.u32 4294901760, %v699_v21  ;;  %v1385_v34 = vsub.f32 %v5226_v2, %v6066_v33  ;;  %v5998_v41 = vand.u32 4294901760, %v5245_v47  ;;  %v6067_v35 = vand.u32 4294901760, %v4882_v55 }
  0xd4   : > { %3914 = vmatprep.subr.bf16.mxu1 %v3913_v22  ;;  %v707_v44 = vand.u32 4294901760, %v706_v16  ;;  %v1392_v53 = vsub.f32 %v5232_v30, %v5990_v7  ;;  %v1360_v21 = vsub.f32 %v5236_v48, %v5995_v43  ;;  %v6068_v63 = vand.u32 4294901760, %v4884_v58 }
  0xd5   : > { %v5269_v57 = vsub.f32 %v4882_v55, %v6067_v35  ;;  %v1386_v33 = vand.u32 4294901760, %v1385_v34  ;;  %v713_v16 = vsub.f32 %v5245_v47, %v5998_v41  ;;  %v6070_v55 = vand.u32 4294901760, %v5255_v62 }
  0xd6   : > { %v5280_v7 = vsub.f32 %v4884_v58, %v6068_v63  ;;  %v5282_v13 = vpack.c.bf16 %v707_v44, %v700_v31  ;;  %v1393_v14 = vand.u32 4294901760, %v1392_v53  ;;  %v1361_v43 = vand.u32 4294901760, %v1360_v21 }
  0xd7   : > { %v720_v35 = vsub.f32 %v5255_v62, %v6070_v55  ;;  %v6007_v25 = vand.u32 4294901760, %v5269_v57  ;;  %v714_v34 = vand.u32 4294901760, %v713_v16  ;;  %v6071_v41 = vand.u32 4294901760, %v4898_v24 }
  0xd8   : > { %6069 = vst [vmem:[#allocation27_spill] sm:$0xff] %v5282_v13  ;;  %v6003_v10 = vand.u32 4294901760, %v5280_v7  ;;  %3726 = vmatprep.subr.bf16.mxu0 %v5282_v13  ;;  %v3917_v58 = vpack.c.bf16 %v1393_v14, %v1386_v33  ;;  %v6072_v44 = vand.u32 4294901760, %v4908_v28  ;;  %3302 = vmatmul.mubr.f32.vlgmr.msra.gmra.mrb[0].mxu1 %v1361_v43  ;;  %v6073_v14 = vand.u32 4294901760, %v4934_v52 }
  0xd9   : > { %v5292_v51 = vsub.f32 %v4898_v24, %v6071_v41  ;;  %v721_v63 = vand.u32 4294901760, %v720_v35  ;;  %v1399_v31 = vsub.f32 %v5269_v57, %v6007_v25  ;;  %3728 = vmatpush3.bf16.msra.mxu0 %v5282_v13  ;;  %v6074_v33 = vand.u32 4294901760, %v4936_v59  ;;  %3916 = vmatpush3.bf16.msra.mxu1 %v3913_v22 }
  0xda   : > { %v5301_v53 = vsub.f32 %v4908_v28, %v6072_v44  ;;  %v1406_v24 = vsub.f32 %v5280_v7, %v6003_v10  ;;  %v5311_v21 = vsub.f32 %v4934_v52, %v6073_v14  ;;  %v6076_v35 = vand.u32 4294901760, %v4950_v32  ;;  %3336 = vmatprep.mubr.f32.mxu1 %v5156_v3  ;;  %3918 = vmatprep.subr.bf16.mxu1 %v3917_v58 }
  0xdb   : > { %v6001_v41 = vand.u32 4294901760, %v5292_v51  ;;  %v5316_v16 = vsub.f32 %v4936_v59, %v6074_v33  ;;  %v5318_v28 = vpack.c.bf16 %v721_v63, %v714_v34  ;;  %v1400_v43 = vand.u32 4294901760, %v1399_v31 }
  0xdc   : > { %v6002_v55 = vand.u32 4294901760, %v5301_v53  ;;  %v5324_v44 = vsub.f32 %v4950_v32, %v6076_v35  ;;  %v1407_v52 = vand.u32 4294901760, %v1406_v24  ;;  %v6004_v22 = vand.u32 4294901760, %v5311_v21 }
  0xdd   : > { %6075 = vst [vmem:[#allocation28_spill] sm:$0xff] %v5318_v28  ;;  %v727_v59 = vsub.f32 %v5292_v51, %v6001_v41  ;;  %v6005_v34 = vand.u32 4294901760, %v5316_v16  ;;  %3730 = vmatprep.subr.bf16.mxu0 %v5318_v28  ;;  %v6077_v31 = vand.u32 4294901760, %v4960_v38  ;;  %v6078_v14 = vand.u32 4294901760, %v4986_v29  ;;  %3920 = vmatpush3.bf16.msra.mxu1 %v3917_v58 }
  0xde   : > { %v734_v63 = vsub.f32 %v5301_v53, %v6002_v55  ;;  %v6006_v32 = vand.u32 4294901760, %v5324_v44  ;;  %3732 = vmatpush3.bf16.msra.mxu0 %v5318_v28  ;;  %v3921_v35 = vpack.c.bf16 %v1407_v52, %v1400_v43  ;;  %v1413_v55 = vsub.f32 %v5311_v21, %v6004_v22 }
  0xdf   : > { %v5340_v24 = vsub.f32 %v4960_v38, %v6077_v31  ;;  %v5345_v33 = vsub.f32 %v4986_v29, %v6078_v14  ;;  %v728_v41 = vand.u32 4294901760, %v727_v59  ;;  %v1420_v10 = vsub.f32 %v5316_v16, %v6005_v34 }
  0xe0   : > { %v735_v38 = vand.u32 4294901760, %v734_v63  ;;  %v741_v31 = vsub.f32 %v5324_v44, %v6006_v32  ;;  %3922 = vmatprep.subr.bf16.mxu1 %v3921_v35  ;;  %v1414_v43 = vand.u32 4294901760, %v1413_v55  ;;  %v6079_v59 = vand.u32 4294901760, %v4988_v9 }
  0xe1   : > { %v6012_v29 = vand.u32 4294901760, %v5340_v24  ;;  %v6010_v14 = vand.u32 4294901760, %v5345_v33  ;;  %v1421_v52 = vand.u32 4294901760, %v1420_v10  ;;  %v6080_v34 = vand.u32 4294901760, %v5002_v39  ;;  %3924 = vmatpush3.bf16.msra.mxu1 %v3921_v35 }
  0xe2   : > { %v5362_v22 = vsub.f32 %v4988_v9, %v6079_v59  ;;  %v5369_v63 = vpack.c.bf16 %v735_v38, %v728_v41  ;;  %v742_v32 = vand.u32 4294901760, %v741_v31  ;;  %v6082_v28 = vand.u32 4294901760, %v5012_v5 }
  0xe3   : > { %v5367_v58 = vsub.f32 %v5002_v39, %v6080_v34  ;;  %v748_v25 = vsub.f32 %v5340_v24, %v6012_v29  ;;  %v1427_v10 = vsub.f32 %v5345_v33, %v6010_v14  ;;  %v3925_v55 = vpack.c.bf16 %v1421_v52, %v1414_v43 }
  0xe4   : > { %6081 = vst [vmem:[#allocation29_spill] sm:$0xff] %v5369_v63  ;;  %v6009_v9 = vand.u32 4294901760, %v5362_v22  ;;  %v5382_v39 = vsub.f32 %v5012_v5, %v6082_v28  ;;  %3734 = vmatprep.subr.bf16.mxu0 %v5369_v63  ;;  %v6083_v38 = vand.u32 4294901760, %v5036_v0  ;;  %v6084_v43 = vand.u32 4294901760, %v5038_v4 }
  0xe5   : > { %v6011_v59 = vand.u32 4294901760, %v5367_v58  ;;  %v749_v41 = vand.u32 4294901760, %v748_v25  ;;  %v1428_v34 = vand.u32 4294901760, %v1427_v10  ;;  %3736 = vmatpush3.bf16.msra.mxu0 %v5369_v63  ;;  %3926 = vmatprep.subr.bf16.mxu1 %v3925_v55 }
  0xe6   : > { %v5388_v31 = vsub.f32 %v5036_v0, %v6083_v38  ;;  %v5393_v52 = vsub.f32 %v5038_v4, %v6084_v43  ;;  %v1434_v5 = vsub.f32 %v5362_v22, %v6009_v9  ;;  %v6014_v28 = vand.u32 4294901760, %v5382_v39  ;;  %3928 = vmatpush3.bf16.msra.mxu1 %v3925_v55 }
  0xe7   : > { %v755_v25 = vsub.f32 %v5367_v58, %v6011_v59  ;;  %v6085_v0 = vand.u32 4294901760, %v5060_v46  ;;  %v5408_v4 = vpack.c.bf16 %v749_v41, %v742_v32  ;;  %v6087_v43 = vand.u32 4294901760, %v5062_v27 }
  0xe8   : > { %v6013_v10 = vand.u32 4294901760, %v5388_v31  ;;  %v6015_v38 = vand.u32 4294901760, %v5393_v52  ;;  %v1435_v14 = vand.u32 4294901760, %v1434_v5  ;;  %v762_v29 = vsub.f32 %v5382_v39, %v6014_v28 }
  0xe9   : > { %v5406_v35 = vsub.f32 %v5060_v46, %v6085_v0  ;;  %6086 = vst [vmem:[#allocation30_spill] sm:$0xff] %v5408_v4  ;;  %v5415_v9 = vsub.f32 %v5062_v27, %v6087_v43  ;;  %v756_v59 = vand.u32 4294901760, %v755_v25  ;;  %3738 = vmatprep.subr.bf16.mxu0 %v5408_v4  ;;  %v6088_v5 = vand.u32 4294901760, %v5083_v45 }
  0xea   : > { %v1441_v32 = vsub.f32 %v5388_v31, %v6013_v10  ;;  %v1448_v27 = vsub.f32 %v5393_v52, %v6015_v38  ;;  %3740 = vmatpush3.bf16.msra.mxu0 %v5408_v4  ;;  %v3929_v55 = vpack.c.bf16 %v1435_v14, %v1428_v34  ;;  %v763_v0 = vand.u32 4294901760, %v762_v29 }
  0xeb   : > { %v6017_v46 = vand.u32 4294901760, %v5406_v35  ;;  %v5432_v25 = vsub.f32 %v5083_v45, %v6088_v5  ;;  %v6089_v10 = vand.u32 4294901760, %v5087_v26  ;;  %v6090_v63 = vand.u32 4294901760, %v5415_v9 }
  0xec   : > { %v1442_v38 = vand.u32 4294901760, %v1441_v32  ;;  %v1449_v41 = vand.u32 4294901760, %v1448_v27  ;;  %3930 = vmatprep.subr.bf16.mxu1 %v3929_v55  ;;  %v5447_v14 = vpack.c.bf16 %v763_v0, %v756_v59  ;;  %v6093_v32 = vand.u32 4294901760, %v5113_v37 }
  0xed   : > { %v769_v43 = vsub.f32 %v5406_v35, %v6017_v46  ;;  %v5441_v28 = vsub.f32 %v5087_v26, %v6089_v10  ;;  %v776_v45 = vsub.f32 %v5415_v9, %v6090_v63  ;;  %v6019_v5 = vand.u32 4294901760, %v5432_v25  ;;  %3932 = vmatpush3.bf16.msra.mxu1 %v3929_v55 }
  0xee   : > { %6091 = vst [vmem:[#allocation31_spill] sm:$0xff] %v5447_v14  ;;  %v6092_v46 = vand.u32 4294901760, %v5102_v23  ;;  %v3933_v26 = vpack.c.bf16 %v1449_v41, %v1442_v38  ;;  %v5461_v59 = vsub.f32 %v5113_v37, %v6093_v32  ;;  %3742 = vmatprep.subr.bf16.mxu0 %v5447_v14 }
  0xef   : > { %v770_v29 = vand.u32 4294901760, %v769_v43  ;;  %v1461_v34 = vand.u32 4294901760, %v5441_v28  ;;  %v777_v10 = vand.u32 4294901760, %v776_v45  ;;  %v1455_v63 = vsub.f32 %v5432_v25, %v6019_v5  ;;  %3744 = vmatpush3.bf16.msra.mxu0 %v5447_v14 }
  0xf0   : > { %v5453_v4 = vsub.f32 %v5102_v23, %v6092_v46  ;;  %v6094_v23 = vand.u32 4294901760, %v5134_v19  ;;  %v6095_v46 = vand.u32 4294901760, %v5147_v11  ;;  %3934 = vmatprep.subr.bf16.mxu1 %v3933_v26  ;;  %v789_v43 = vand.u32 4294901760, %v5461_v59 }
  0xf1   : > { %v1462_v27 = vsub.f32 %v5441_v28, %v1461_v34  ;;  %v5477_v37 = vpack.c.bf16 %v777_v10, %v770_v29  ;;  %v1456_v55 = vand.u32 4294901760, %v1455_v63  ;;  %3936 = vmatpush3.bf16.msra.mxu1 %v3933_v26  ;;  %v5492_v26 = vpack.c.bf16 %v5131_v15, %v5126_v61 }
  0xf2   : > { %v782_v0 = vand.u32 4294901760, %v5453_v4  ;;  %v5469_v38 = vsub.f32 %v5134_v19, %v6094_v23  ;;  %v5474_v41 = vsub.f32 %v5147_v11, %v6095_v46  ;;  %v790_v11 = vsub.f32 %v5461_v59, %v789_v43 }
  0xf3   : > { %6096 = vst [vmem:[#allocation32_spill] sm:$0xff] %v5477_v37  ;;  %v1463_v45 = vand.u32 4294901760, %v1462_v27  ;;  %3746 = vmatprep.subr.bf16.mxu0 %v5477_v37 }
  0xf4   : > { %v783_v32 = vsub.f32 %v5453_v4, %v782_v0  ;;  %v1468_v5 = vand.u32 4294901760, %v5469_v38  ;;  %v1475_v19 = vand.u32 4294901760, %v5474_v41  ;;  %3748 = vmatpush3.bf16.msra.mxu0 %v5477_v37  ;;  %v791_v63 = vand.u32 4294901760, %v790_v11 }
  0xf5   : > { %v3937_v23 = vpack.c.bf16 %v1463_v45, %v1456_v55  ;;  %v3945_v55 = vpack.c.bf16 %v5182_v50, %v5169_v40  ;;  %v5499_v45 = vpack.c.bf16 %v5217_v60, %v5205_v36  ;;  %v6098_v11 = vand.u32 4294901760, %v5126_v61 }
  0xf6   : > { %v784_v46 = vand.u32 4294901760, %v783_v32  ;;  %v1469_v29 = vsub.f32 %v5469_v38, %v1468_v5  ;;  %v1476_v10 = vsub.f32 %v5474_v41, %v1475_v19  ;;  %v3949_v32 = vpack.c.bf16 %v5232_v30, %v5226_v2 }
  0xf7   : > { %3938 = vmatprep.subr.bf16.mxu1 %v3937_v23  ;;  %v6104_v61 = vand.u32 4294901760, %v5226_v2  ;;  %v6110_v2 = vand.u32 4294901760, %v5292_v51 }
  0xf8   : > { %v1470_v27 = vand.u32 4294901760, %v1469_v29  ;;  %v1477_v14 = vand.u32 4294901760, %v1476_v10  ;;  %3940 = vmatpush3.bf16.msra.mxu1 %v3937_v23  ;;  %v5488_v13 = vpack.c.bf16 %v791_v63, %v784_v46  ;;  %v6099_v23 = vand.u32 4294901760, %v5131_v15 }
  0xf9   : > { %v6101_v29 = vand.u32 4294901760, %v5182_v50  ;;  %v6102_v63 = vand.u32 4294901760, %v5205_v36  ;;  %v6105_v15 = vand.u32 4294901760, %v5232_v30  ;;  %v6107_v50 = vand.u32 4294901760, %v5255_v62 }
  0xfa   : > { %6097 = vst [vmem:[#allocation33_spill] sm:$0xff] %v5488_v13  ;;  %v3941_v3 = vpack.c.bf16 %v1477_v14, %v1470_v27  ;;  %3750 = vmatprep.subr.bf16.mxu0 %v5488_v13  ;;  %v5507_v46 = vpack.c.bf16 %v6099_v23, %v6098_v11  ;;  %v6100_v14 = vand.u32 4294901760, %v5169_v40  ;;  %v6103_v27 = vand.u32 4294901760, %v5217_v60 }
  0xfb   : > { %3752 = vmatpush3.bf16.msra.mxu0 %v5488_v13  ;;  %v5526_v11 = vpack.c.bf16 %v6105_v15, %v6104_v61  ;;  %v6106_v40 = vand.u32 4294901760, %v5245_v47  ;;  %v6108_v36 = vand.u32 4294901760, %v5269_v57  ;;  %v6109_v60 = vand.u32 4294901760, %v5280_v7 }
  0xfc   : > { %v5513_v10 = vpack.c.bf16 %v6101_v29, %v6100_v14  ;;  %3942 = vmatprep.subr.bf16.mxu1 %v3941_v3  ;;  %v5520_v37 = vpack.c.bf16 %v6103_v27, %v6102_v63  ;;  %3754 = vmatprep.subr.bf16.mxu0 %v5492_v26  ;;  %v6111_v30 = vand.u32 4294901760, %v5301_v53  ;;  %v6112_v63 = vand.u32 4294901760, %v5311_v21 }
  0xfd   : > { %v5532_v23 = vpack.c.bf16 %v6107_v50, %v6106_v40  ;;  %3944 = vmatpush3.bf16.msra.mxu1 %v3941_v3  ;;  %v5539_v14 = vpack.c.bf16 %v6109_v60, %v6108_v36  ;;  %v6113_v27 = vand.u32 4294901760, %v5316_v16  ;;  %v6115_v3 = vand.u32 4294901760, %v5324_v44 }
  0xfe   : > { %v5545_v29 = vpack.c.bf16 %v6111_v30, %v6110_v2  ;;  %3946 = vmatprep.subr.bf16.mxu1 %v3945_v55  ;;  %v6116_v15 = vand.u32 4294901760, %v5340_v24  ;;  %v6117_v50 = vand.u32 4294901760, %v5345_v33  ;;  %v6118_v36 = vand.u32 4294901760, %v5362_v22  ;;  %3127 = vmatmul.mubr.f32.vlgmr.msra.gmra.mrb[0].mxu0 %v5139_v17 }
  0xff   : > { %v5551_v61 = vpack.c.bf16 %v6113_v27, %v6112_v63  ;;  %v6120_v2 = vand.u32 4294901760, %v5367_v58  ;;  %v6121_v30 = vand.u32 4294901760, %v5382_v39  ;;  %v6122_v63 = vand.u32 4294901760, %v5388_v31  ;;  %3756 = vmatpush3.bf16.msra.mxu0 %v5492_v26  ;;  %3161 = vmatprep.mubr.f32.mxu0 %v5137_v49 }
 0x100   : > { %v5557_v40 = vpack.c.bf16 %v6116_v15, %v6115_v3  ;;  %v5563_v60 = vpack.c.bf16 %v6118_v36, %v6117_v50  ;;  %v6123_v27 = vand.u32 4294901760, %v5393_v52  ;;  %v6124_v3 = vand.u32 4294901760, %v5406_v35  ;;  %3337 = vmatmul.mubr.f32.vlgmr.msra.gmra.mrb[0].mxu1 %v5220_v12  ;;  %3758 = vmatprep.subr.bf16.mxu0 %v5499_v45 }
 0x101   : > { %6114 = vst [vmem:[#allocation34_spill] sm:$0xff] %v5551_v61  ;;  %v5569_v13 = vpack.c.bf16 %v6121_v30, %v6120_v2  ;;  %v6125_v15 = vand.u32 4294901760, %v5415_v9  ;;  %v6126_v36 = vand.u32 4294901760, %v5432_v25  ;;  %v5588_v2 = vpack.c.bf16 %v789_v43, %v782_v0  ;;  %3948 = vmatpush3.bf16.msra.mxu1 %v3945_v55  ;;  %3371 = vmatprep.mubr.f32.mxu1 %v5177_v18  ;;  %v6142_v0 = vld [vmem:[#allocation24_spill] sm:$0xff]  ;;  %v6148_v43 = vld [vmem:[#allocation29_spill] sm:$0xff]  ;;  %v6149_v55 = vld [vmem:[#allocation30_spill] sm:$0xff] }
 0x102   : > { %6119 = vst [vmem:[#allocation35_spill] sm:$0xff] %v5563_v60  ;;  %v5575_v61 = vpack.c.bf16 %v6123_v27, %v6122_v63  ;;  %v5590_v30 = vpack.c.bf16 %v1475_v19, %v1468_v5  ;;  %v5597_v63 = vpack.c.bf16 %v5255_v62, %v5245_v47  ;;  %3950 = vmatprep.subr.bf16.mxu1 %v3949_v32 }
 0x103   : > { %v5582_v50 = vpack.c.bf16 %v6125_v15, %v6124_v3  ;;  %v5586_v60 = vpack.c.bf16 %v1461_v34, %v6126_v36  ;;  %v3953_v34 = vpack.c.bf16 %v5280_v7, %v5269_v57  ;;  %3760 = vmatpush3.bf16.msra.mxu0 %v5499_v45  ;;  %v5607_v5 = vpack.c.bf16 %v5301_v53, %v5292_v51 }
 0x104   : > { %3762 = vmatprep.subr.bf16.mxu0 %v5597_v63  ;;  %v3957_v62 = vpack.c.bf16 %v5316_v16, %v5311_v21  ;;  %v5615_v47 = vpack.c.bf16 %v5340_v24, %v5324_v44  ;;  %v3961_v7 = vpack.c.bf16 %v5362_v22, %v5345_v33  ;;  %v5623_v51 = vpack.c.bf16 %v5382_v39, %v5367_v58  ;;  %v6129_v33 = vld [vmem:[#allocation14_spill] sm:$0xff]  ;;  %v6130_v58 = vld [vmem:[#allocation15_spill] sm:$0xff] }
 0x105   : > { %3952 = vmatpush3.bf16.msra.mxu1 %v3949_v32  ;;  %v3965_v57 = vpack.c.bf16 %v5393_v52, %v5388_v31  ;;  %v5631_v53 = vpack.c.bf16 %v5415_v9, %v5406_v35  ;;  %v3969_v21 = vpack.c.bf16 %v5441_v28, %v5432_v25  ;;  %v5639_v16 = vpack.c.bf16 %v5461_v59, %v5453_v4  ;;  %v6133_v9 = vld [vmem:[#allocation18_spill] sm:$0xff]  ;;  %v6134_v39 = vld [vmem:[#allocation19_spill] sm:$0xff]  ;;  %v6135_v31 = vld [vmem:[#allocation20_spill] sm:$0xff] }
 0x106   : > { %3954 = vmatprep.subr.bf16.mxu1 %v3953_v34  ;;  %v3973_v44 = vpack.c.bf16 %v5474_v41, %v5469_v38  ;;  %v6127_v22 = vand.u32 4294901760, %v5137_v49  ;;  %v6128_v24 = vand.u32 4294901760, %v5177_v18  ;;  %v6131_v49 = vld [vmem:[#allocation16_spill] sm:$0xff]  ;;  %v6132_v18 = vld [vmem:[#allocation17_spill] sm:$0xff]  ;;  %v6137_v28 = vld [vmem:[#allocation23_spill] sm:$0xff]  ;;  %v6139_v4 = vand.u32 4294901760, %v5154_v1 }
 0x107   : > { %3764 = vmatpush3.bf16.msra.mxu0 %v5597_v63  ;;  %v6136_v52 = vld [vmem:[#allocation21_spill] sm:$0xff]  ;;  %v6140_v25 = vand.u32 4294901760, %v5236_v48  ;;  %v6141_v59 = vld [vmem:[#allocation22_spill] sm:$0xff]  ;;  %v6147_v38 = vld [vmem:[#allocation28_spill] sm:$0xff] }
 0x108   : > { %3766 = vmatprep.subr.bf16.mxu0 %v5607_v5  ;;  %v6138_v35 = vld [vmem:[#allocation25_spill] sm:$0xff] }
 0x109   : > { %3956 = vmatpush3.bf16.msra.mxu1 %v3953_v34 }
 0x10a   : > { %3958 = vmatprep.subr.bf16.mxu1 %v3957_v62 }
 0x10b   : > { %3768 = vmatpush3.bf16.msra.mxu0 %v5607_v5 }
 0x10c   : > { %3770 = vmatprep.subr.bf16.mxu0 %v5615_v47 }
 0x10d   : > { %3960 = vmatpush3.bf16.msra.mxu1 %v3957_v62 }
 0x10e   : > { %3962 = vmatprep.subr.bf16.mxu1 %v3961_v7 }
 0x10f   : > { %3772 = vmatpush3.bf16.msra.mxu0 %v5615_v47 }
 0x110   : > { %3774 = vmatprep.subr.bf16.mxu0 %v5623_v51 }
 0x111   : > { %3964 = vmatpush3.bf16.msra.mxu1 %v3961_v7 }
 0x112   : > { %3966 = vmatprep.subr.bf16.mxu1 %v3965_v57 }
 0x113   : > { %3776 = vmatpush3.bf16.msra.mxu0 %v5623_v51 }
 0x114   : > { %3778 = vmatprep.subr.bf16.mxu0 %v5631_v53 }
 0x115   : > { %3968 = vmatpush3.bf16.msra.mxu1 %v3965_v57 }
 0x116   : > { %3970 = vmatprep.subr.bf16.mxu1 %v3969_v21 }
 0x117   : > { %3780 = vmatpush3.bf16.msra.mxu0 %v5631_v53 }
 0x118   : > { %3782 = vmatprep.subr.bf16.mxu0 %v5639_v16 }
 0x119   : > { %3972 = vmatpush3.bf16.msra.mxu1 %v3969_v21 }
 0x11a   : > { %3974 = vmatprep.subr.bf16.mxu1 %v3973_v44 }
 0x11b   : > { %3784 = vmatpush3.bf16.msra.mxu0 %v5639_v16 }
 0x11c   : > { %3786 = vmatprep.subr.bf16.mxu0 %v4777_v42 }
 0x11d   : > { %3976 = vmatpush3.bf16.msra.mxu1 %v3973_v44 }
 0x11e   : > { %3978 = vmatprep.subr.bf16.mxu1 %v4802_v56  ;;  %3162 = vmatmul.mubr.f32.vlgmr.msra.gmra.mrb[0].mxu0 %v5154_v1  ;;  %v6143_v1 = vld [vmem:[#allocation34_spill] sm:$0xff] }
 0x11f   : > { %3788 = vmatpush3.bf16.msra.mxu0 %v4777_v42  ;;  %3196 = vmatprep.mubr.f32.mxu0 %v6127_v22 }
 0x120   : > { %3372 = vmatmul.mubr.f32.vlgmr.msra.gmra.mrb[0].mxu1 %v5236_v48  ;;  %3790 = vmatprep.subr.bf16.mxu0 %v4828_v20  ;;  %v6144_v48 = vld [vmem:[#allocation35_spill] sm:$0xff] }
 0x121   : > { %3980 = vmatpush3.bf16.msra.mxu1 %v4802_v56  ;;  %3406 = vmatprep.mubr.f32.mxu1 %v6128_v24 }
 0x122   : > { %3982 = vmatprep.subr.bf16.mxu1 %v4854_v6 }
 0x123   : > { %3792 = vmatpush3.bf16.msra.mxu0 %v4828_v20 }
 0x124   : > { %3794 = vmatprep.subr.bf16.mxu0 %v4880_v54 }
 0x125   : > { %3984 = vmatpush3.bf16.msra.mxu1 %v4854_v6 }
 0x126   : > { %3986 = vmatprep.subr.bf16.mxu1 %v4906_v8 }
 0x127   : > { %3796 = vmatpush3.bf16.msra.mxu0 %v4880_v54 }
 0x128   : > { %3798 = vmatprep.subr.bf16.mxu0 %v6129_v33 }
 0x129   : > { %3988 = vmatpush3.bf16.msra.mxu1 %v4906_v8 }
 0x12a   : > { %3990 = vmatprep.subr.bf16.mxu1 %v6130_v58 }
 0x12b   : > { %3800 = vmatpush3.bf16.msra.mxu0 %v6129_v33 }
 0x12c   : > { %3802 = vmatprep.subr.bf16.mxu0 %v6131_v49 }
 0x12d   : > { %3992 = vmatpush3.bf16.msra.mxu1 %v6130_v58 }
 0x12e   : > { %3994 = vmatprep.subr.bf16.mxu1 %v6132_v18 }
 0x12f   : > { %3804 = vmatpush3.bf16.msra.mxu0 %v6131_v49 }
 0x130   : > { %3806 = vmatprep.subr.bf16.mxu0 %v6133_v9 }
 0x131   : > { %3996 = vmatpush3.bf16.msra.mxu1 %v6132_v18 }
 0x132   : > { %3998 = vmatprep.subr.bf16.mxu1 %v6134_v39 }
 0x133   : > { %3808 = vmatpush3.bf16.msra.mxu0 %v6133_v9 }
 0x134   : > { %3810 = vmatprep.subr.bf16.mxu0 %v6135_v31 }
 0x135   : > { %4000 = vmatpush3.bf16.msra.mxu1 %v6134_v39 }
 0x136   : > { %4002 = vmatprep.subr.bf16.mxu1 %v6136_v52 }
 0x137   : > { %3812 = vmatpush3.bf16.msra.mxu0 %v6135_v31 }
 0x138   : > { %3814 = vmatprep.subr.bf16.mxu0 %v6137_v28 }
 0x139   : > { %4004 = vmatpush3.bf16.msra.mxu1 %v6136_v52 }
 0x13a   : > { %4006 = vmatprep.subr.bf16.mxu1 %v6138_v35 }
 0x13b   : > { %3816 = vmatpush3.bf16.msra.mxu0 %v6137_v28 }
 0x13c   : > { %3818 = vmatprep.subr.bf16.mxu0 %v5507_v46 }
 0x13d   : > { %4008 = vmatpush3.bf16.msra.mxu1 %v6138_v35 }
 0x13e   : > { %4010 = vmatprep.subr.bf16.mxu1 %v5513_v10  ;;  %3197 = vmatmul.mubr.f32.vlgmr.msra.gmra.mrb[0].mxu0 %v6139_v4 }
 0x13f   : > { %3820 = vmatpush3.bf16.msra.mxu0 %v5507_v46  ;;  %3231 = vmatprep.mubr.f32.mxu0 %v6141_v59 }
 0x140   : > { %3407 = vmatmul.mubr.f32.vlgmr.msra.gmra.mrb[0].mxu1 %v6140_v25  ;;  %3822 = vmatprep.subr.bf16.mxu0 %v5520_v37 }
 0x141   : > { %4012 = vmatpush3.bf16.msra.mxu1 %v5513_v10  ;;  %3441 = vmatprep.mubr.f32.mxu1 %v6142_v0  ;;  %v6150_v10 = vld [vmem:[#allocation31_spill] sm:$0xff] }
 0x142   : > { %4014 = vmatprep.subr.bf16.mxu1 %v5526_v11 }
 0x143   : > { %3824 = vmatpush3.bf16.msra.mxu0 %v5520_v37 }
 0x144   : > { %3826 = vmatprep.subr.bf16.mxu0 %v5532_v23 }
 0x145   : > { %4016 = vmatpush3.bf16.msra.mxu1 %v5526_v11 }
 0x146   : > { %4018 = vmatprep.subr.bf16.mxu1 %v5539_v14 }
 0x147   : > { %3828 = vmatpush3.bf16.msra.mxu0 %v5532_v23 }
 0x148   : > { %3830 = vmatprep.subr.bf16.mxu0 %v5545_v29 }
 0x149   : > { %4020 = vmatpush3.bf16.msra.mxu1 %v5539_v14  ;;  %v6151_v14 = vld [vmem:[#allocation32_spill] sm:$0xff] }
 0x14a   : > { %4022 = vmatprep.subr.bf16.mxu1 %v6143_v1 }
 0x14b   : > { %3832 = vmatpush3.bf16.msra.mxu0 %v5545_v29 }
 0x14c   : > { %3834 = vmatprep.subr.bf16.mxu0 %v5557_v40 }
 0x14d   : > { %4024 = vmatpush3.bf16.msra.mxu1 %v6143_v1 }
 0x14e   : > { %4026 = vmatprep.subr.bf16.mxu1 %v6144_v48 }
 0x14f   : > { %3836 = vmatpush3.bf16.msra.mxu0 %v5557_v40 }
 0x150   : > { %3838 = vmatprep.subr.bf16.mxu0 %v5569_v13 }
 0x151   : > { %4028 = vmatpush3.bf16.msra.mxu1 %v6144_v48 }
 0x152   : > { %4030 = vmatprep.subr.bf16.mxu1 %v5575_v61 }
 0x153   : > { %3840 = vmatpush3.bf16.msra.mxu0 %v5569_v13 }
 0x154   : > { %3842 = vmatprep.subr.bf16.mxu0 %v5582_v50 }
 0x155   : > { %4032 = vmatpush3.bf16.msra.mxu1 %v5575_v61 }
 0x156   : > { %4034 = vmatprep.subr.bf16.mxu1 %v5586_v60 }
 0x157   : > { %3844 = vmatpush3.bf16.msra.mxu0 %v5582_v50 }
 0x158   : > { %3846 = vmatprep.subr.bf16.mxu0 %v5588_v2 }
 0x159   : > { %4036 = vmatpush3.bf16.msra.mxu1 %v5586_v60  ;;  %v6152_v60 = vld [vmem:[#allocation33_spill] sm:$0xff] }
 0x15a   : > { %4038 = vmatprep.subr.bf16.mxu1 %v5590_v30 }
 0x15b   : > { %3848 = vmatpush3.bf16.msra.mxu0 %v5588_v2 }
 0x15c   : > { %3850 = vmatprep.subr.bf16.mxu0 %v4777_v42 }
 0x15d   : > { %4040 = vmatpush3.bf16.msra.mxu1 %v5590_v30 }
 0x15e   : > { %4042 = vmatprep.subr.bf16.mxu1 %v4802_v56  ;;  %3232 = vmatmul.mubr.f32.vlgmr.msra.gmra.mrb[0].mxu0 %v5139_v17 }
 0x15f   : > { %3852 = vmatpush3.bf16.msra.mxu0 %v4777_v42  ;;  %3266 = vmatprep.mubr.f32.mxu0 %v6141_v59 }
 0x160   : > { %3442 = vmatmul.mubr.f32.vlgmr.msra.gmra.mrb[0].mxu1 %v5220_v12  ;;  %3854 = vmatprep.subr.bf16.mxu0 %v4828_v20 }
 0x161   : > { %4044 = vmatpush3.bf16.msra.mxu1 %v4802_v56  ;;  %3476 = vmatprep.mubr.f32.mxu1 %v6142_v0  ;;  %v4473_v56 = vmov 0.0|0.0  }
 0x162   : > { %4046 = vmatprep.subr.bf16.mxu1 %v4854_v6 }
 0x163   : > { %3856 = vmatpush3.bf16.msra.mxu0 %v4828_v20 }
 0x164   : > { %3858 = vmatprep.subr.bf16.mxu0 %v4880_v54 }
 0x165   : > { %4048 = vmatpush3.bf16.msra.mxu1 %v4854_v6  ;;  %v6145_v6 = vld [vmem:[#allocation26_spill] sm:$0xff] }
 0x166   : > { %4050 = vmatprep.subr.bf16.mxu1 %v4906_v8 }
 0x167   : > { %3860 = vmatpush3.bf16.msra.mxu0 %v4880_v54 }
 0x168   : > { %3862 = vmatprep.subr.bf16.mxu0 %v6129_v33 }
 0x169   : > { %4052 = vmatpush3.bf16.msra.mxu1 %v4906_v8  ;;  %v4475_v8 = vmov 0.0  }
 0x16a   : > { %4054 = vmatprep.subr.bf16.mxu1 %v6130_v58 }
 0x16b   : > { %3864 = vmatpush3.bf16.msra.mxu0 %v6129_v33 }
 0x16c   : > { %3866 = vmatprep.subr.bf16.mxu0 %v6131_v49 }
 0x16d   : > { %4056 = vmatpush3.bf16.msra.mxu1 %v6130_v58  ;;  %v2606_v58 = vstv %s2605_s30 }
 0x16e   : > { %4058 = vmatprep.subr.bf16.mxu1 %v6132_v18 }
 0x16f   : > { %3868 = vmatpush3.bf16.msra.mxu0 %v6131_v49 }
 0x170   : > { %3870 = vmatprep.subr.bf16.mxu0 %v6133_v9 }
 0x171   : > { %4060 = vmatpush3.bf16.msra.mxu1 %v6132_v18 }
 0x172   : > { %4062 = vmatprep.subr.bf16.mxu1 %v6134_v39 }
 0x173   : > { %3872 = vmatpush3.bf16.msra.mxu0 %v6133_v9 }
 0x174   : > { %3874 = vmatprep.subr.bf16.mxu0 %v6135_v31 }
 0x175   : > { %4064 = vmatpush3.bf16.msra.mxu1 %v6134_v39 }
 0x176   : > { %4066 = vmatprep.subr.bf16.mxu1 %v6136_v52 }
 0x177   : > { %3876 = vmatpush3.bf16.msra.mxu0 %v6135_v31 }
 0x178   : > { %3878 = vmatprep.subr.bf16.mxu0 %v6137_v28 }
 0x179   : > { %4068 = vmatpush3.bf16.msra.mxu1 %v6136_v52 }
 0x17a   : > { %4070 = vmatprep.subr.bf16.mxu1 %v6138_v35 }
 0x17b   : > { %3880 = vmatpush3.bf16.msra.mxu0 %v6137_v28 }
 0x17c   : > { %4073 = vmatprep.subr.bf16.mxu0 %v4473_v56 }
 0x17d   : > { %4072 = vmatpush3.bf16.msra.mxu1 %v6138_v35 }
 0x17e   : > { %4097 = vmatprep.subr.bf16.mxu1 %v4473_v56  ;;  %3267 = vmatmul.mubr.f32.vlgmr.msra.gmra.mrb[0].mxu0 %v5139_v17  ;;  %v6146_v17 = vld [vmem:[#allocation27_spill] sm:$0xff] }
 0x17f   : > { %4075 = vmatpush3.bf16.msra.mxu0 %v4777_v42  ;;  %3511 = vmatprep.mubr.msk.f32.mxu0 %vm4474_vm0, %v4475_v8 }
 0x180   : > { %3477 = vmatmul.mubr.f32.vlgmr.msra.gmra.mrb[0].mxu1 %v5220_v12  ;;  %4076 = vmatprep.subr.bf16.mxu0 %v4473_v56  ;;  %v1950_v12 = vld [vmem:[%s5929_s3] sm:$0x1] }
 0x181   : > { %4099 = vmatpush3.bf16.msra.mxu1 %v6145_v6  ;;  %3546 = vmatprep.mubr.msk.f32.mxu1 %vm4474_vm0, %v4475_v8  ;;  %v5781_v41 = vand.u32 4294901760, %v1950_v12 }
 0x182   : > { %4100 = vmatprep.subr.bf16.mxu1 %v4473_v56 }
 0x183   : > { %4078 = vmatpush3.bf16.msra.mxu0 %v4828_v20  ;;  %v2033_v19 = vsub.f32 %v1950_v12, %v5781_v41 }
 0x184   : > { %4079 = vmatprep.subr.bf16.mxu0 %v4473_v56 }
 0x185   : > { %4102 = vmatpush3.bf16.msra.mxu1 %v6146_v17  ;;  %v2034_v32 = vand.u32 4294901760, %v2033_v19 }
 0x186   : > { %4103 = vmatprep.subr.bf16.mxu1 %v4473_v56 }
 0x187   : > { %4081 = vmatpush3.bf16.msra.mxu0 %v4880_v54  ;;  %v2035_v11 = vsub.f32 %v2033_v19, %v2034_v32 }
 0x188   : > { %4082 = vmatprep.subr.bf16.mxu0 %v4473_v56 }
 0x189   : > { %4105 = vmatpush3.bf16.msra.mxu1 %v6147_v38  ;;  %v2036_v61 = vand.u32 4294901760, %v2035_v11 }
 0x18a   : > { %4106 = vmatprep.subr.bf16.mxu1 %v4473_v56 }
 0x18b   : > { %4084 = vmatpush3.bf16.msra.mxu0 %v6129_v33 }
 0x18c   : > { %4085 = vmatprep.subr.bf16.mxu0 %v4473_v56 }
 0x18d   : > { %4108 = vmatpush3.bf16.msra.mxu1 %v6148_v43 }
 0x18e   : > { %4109 = vmatprep.subr.bf16.mxu1 %v4473_v56 }
 0x18f   : > { %4087 = vmatpush3.bf16.msra.mxu0 %v6131_v49 }
 0x190   : > { %4088 = vmatprep.subr.bf16.mxu0 %v4473_v56 }
 0x191   : > { %4111 = vmatpush3.bf16.msra.mxu1 %v6149_v55 }
 0x192   : > { %4112 = vmatprep.subr.bf16.mxu1 %v4473_v56 }
 0x193   : > { %4090 = vmatpush3.bf16.msra.mxu0 %v6133_v9 }
 0x194   : > { %4091 = vmatprep.subr.bf16.mxu0 %v4473_v56 }
 0x195   : > { %4114 = vmatpush3.bf16.msra.mxu1 %v6150_v10 }
 0x196   : > { %4115 = vmatprep.subr.bf16.mxu1 %v4473_v56 }
 0x197   : > { %4093 = vmatpush3.bf16.msra.mxu0 %v6135_v31 }
 0x198   : > { %4094 = vmatprep.subr.bf16.mxu0 %v4473_v56 }
 0x199   : > { %4117 = vmatpush3.bf16.msra.mxu1 %v6151_v14 }
 0x19a   : > { %4118 = vmatprep.subr.bf16.mxu1 %v4473_v56 }
 0x19b   : > { %4096 = vmatpush3.bf16.msra.mxu0 %v6137_v28 }
 0x19c   : > { %4121 = vmatprep.subr.bf16.mxu0 %v4473_v56 }
 0x19d   : > { %4120 = vmatpush3.bf16.msra.mxu1 %v6152_v60 }
 0x19e   : > { %4145 = vmatprep.subr.bf16.mxu1 %v4473_v56  ;;  %3512 = vmatmul.mubr.f32.vlgmr.msra.gmra.mrb[2].mxu0 %v2036_v61 }
 0x19f   : > { %4123 = vmatpush3.bf16.msra.mxu0 %v5492_v26  ;;  %3581 = vmatprep.mubr.msk.f32.mxu0 %vm4474_vm0, %v4475_v8 }
 0x1a0   : > { %3547 = vmatmul.mubr.f32.vlgmr.msra.gmra.mrb[2].mxu1 %v5781_v41  ;;  %4124 = vmatprep.subr.bf16.mxu0 %v4473_v56 }
 0x1a1   : > { %4147 = vmatpush3.bf16.msra.mxu1 %v4777_v42  ;;  %3616 = vmatprep.mubr.msk.f32.mxu1 %vm4474_vm0, %v4475_v8 }
 0x1a2   : > { %4148 = vmatprep.subr.bf16.mxu1 %v4473_v56 }
 0x1a3   : > { %4126 = vmatpush3.bf16.msra.mxu0 %v5499_v45 }
 0x1a4   : > { %4127 = vmatprep.subr.bf16.mxu0 %v4473_v56 }
 0x1a5   : > { %4150 = vmatpush3.bf16.msra.mxu1 %v4828_v20 }
 0x1a6   : > { %4151 = vmatprep.subr.bf16.mxu1 %v4473_v56 }
 0x1a7   : > { %4129 = vmatpush3.bf16.msra.mxu0 %v5597_v63 }
 0x1a8   : > { %4130 = vmatprep.subr.bf16.mxu0 %v4473_v56 }
 0x1a9   : > { %4153 = vmatpush3.bf16.msra.mxu1 %v4880_v54 }
 0x1aa   : > { %4154 = vmatprep.subr.bf16.mxu1 %v4473_v56 }
 0x1ab   : > { %4132 = vmatpush3.bf16.msra.mxu0 %v5607_v5 }
 0x1ac   : > { %4133 = vmatprep.subr.bf16.mxu0 %v4473_v56 }
 0x1ad   : > { %4156 = vmatpush3.bf16.msra.mxu1 %v6129_v33 }
 0x1ae   : > { %4157 = vmatprep.subr.bf16.mxu1 %v4473_v56 }
 0x1af   : > { %4135 = vmatpush3.bf16.msra.mxu0 %v5615_v47 }
 0x1b0   : > { %4136 = vmatprep.subr.bf16.mxu0 %v4473_v56 }
 0x1b1   : > { %4159 = vmatpush3.bf16.msra.mxu1 %v6131_v49 }
 0x1b2   : > { %4160 = vmatprep.subr.bf16.mxu1 %v4473_v56 }
 0x1b3   : > { %4138 = vmatpush3.bf16.msra.mxu0 %v5623_v51 }
 0x1b4   : > { %4139 = vmatprep.subr.bf16.mxu0 %v4473_v56 }
 0x1b5   : > { %4162 = vmatpush3.bf16.msra.mxu1 %v6133_v9 }
 0x1b6   : > { %4163 = vmatprep.subr.bf16.mxu1 %v4473_v56 }
 0x1b7   : > { %4141 = vmatpush3.bf16.msra.mxu0 %v5631_v53 }
 0x1b8   : > { %4142 = vmatprep.subr.bf16.mxu0 %v4473_v56 }
 0x1b9   : > { %4165 = vmatpush3.bf16.msra.mxu1 %v6135_v31 }
 0x1ba   : > { %4166 = vmatprep.subr.bf16.mxu1 %v4473_v56 }
 0x1bb   : > { %4144 = vmatpush3.bf16.msra.mxu0 %v5639_v16 }
 0x1bc   : > { %4169 = vmatprep.subr.bf16.mxu0 %v4473_v56 }
 0x1bd   : > { %4168 = vmatpush3.bf16.msra.mxu1 %v6137_v28 }
 0x1be   : > { %4193 = vmatprep.subr.bf16.mxu1 %v4473_v56  ;;  %3582 = vmatmul.mubr.f32.vlgmr.msra.gmra.mrb[4].mxu0 %v2033_v19 }
 0x1bf   : > { %4171 = vmatpush3.bf16.msra.mxu0 %v5507_v46  ;;  %3651 = vmatprep.mubr.msk.f32.mxu0 %vm4474_vm0, %v4475_v8 }
 0x1c0   : > { %3617 = vmatmul.mubr.f32.vlgmr.msra.gmra.mrb[4].mxu1 %v2034_v32  ;;  %4172 = vmatprep.subr.bf16.mxu0 %v4473_v56 }
 0x1c1   : > { %4195 = vmatpush3.bf16.msra.mxu1 %v4777_v42  ;;  %3686 = vmatprep.mubr.msk.f32.mxu1 %vm4474_vm0, %v4475_v8 }
 0x1c2   : > { %4196 = vmatprep.subr.bf16.mxu1 %v4473_v56 }
 0x1c3   : > { %4174 = vmatpush3.bf16.msra.mxu0 %v5520_v37 }
 0x1c4   : > { %4175 = vmatprep.subr.bf16.mxu0 %v4473_v56 }
 0x1c5   : > { %4198 = vmatpush3.bf16.msra.mxu1 %v4828_v20 }
 0x1c6   : > { %4199 = vmatprep.subr.bf16.mxu1 %v4473_v56 }
 0x1c7   : > { %4177 = vmatpush3.bf16.msra.mxu0 %v5532_v23 }
 0x1c8   : > { %4178 = vmatprep.subr.bf16.mxu0 %v4473_v56 }
 0x1c9   : > { %4201 = vmatpush3.bf16.msra.mxu1 %v4880_v54 }
 0x1ca   : > { %4202 = vmatprep.subr.bf16.mxu1 %v4473_v56 }
 0x1cb   : > { %4180 = vmatpush3.bf16.msra.mxu0 %v5545_v29 }
 0x1cc   : > { %4181 = vmatprep.subr.bf16.mxu0 %v4473_v56 }
 0x1cd   : > { %4204 = vmatpush3.bf16.msra.mxu1 %v6129_v33 }
 0x1ce   : > { %4205 = vmatprep.subr.bf16.mxu1 %v4473_v56 }
 0x1cf   : > { %4183 = vmatpush3.bf16.msra.mxu0 %v5557_v40 }
 0x1d0   : > { %4184 = vmatprep.subr.bf16.mxu0 %v4473_v56 }
 0x1d1   : > { %4207 = vmatpush3.bf16.msra.mxu1 %v6131_v49 }
 0x1d2   : > { %4208 = vmatprep.subr.bf16.mxu1 %v4473_v56 }
 0x1d3   : > { %4186 = vmatpush3.bf16.msra.mxu0 %v5569_v13 }
 0x1d4   : > { %4187 = vmatprep.subr.bf16.mxu0 %v4473_v56 }
 0x1d5   : > { %4210 = vmatpush3.bf16.msra.mxu1 %v6133_v9 }
 0x1d6   : > { %4211 = vmatprep.subr.bf16.mxu1 %v4473_v56 }
 0x1d7   : > { %4189 = vmatpush3.bf16.msra.mxu0 %v5582_v50 }
 0x1d8   : > { %4190 = vmatprep.subr.bf16.mxu0 %v4473_v56 }
 0x1d9   : > { %4213 = vmatpush3.bf16.msra.mxu1 %v6135_v31 }
 0x1da   : > { %4214 = vmatprep.subr.bf16.mxu1 %v4473_v56 }
 0x1db   : > { %4192 = vmatpush3.bf16.msra.mxu0 %v5588_v2 }
 0x1dd   : > { %4216 = vmatpush3.bf16.msra.mxu1 %v6137_v28 }
 0x1de   : > { %3652 = vmatmul.mubr.f32.vlgmr.msra.gmra.mrb[6].mxu0 %v5781_v41 }
 0x1e0   : > { %3687 = vmatmul.mubr.f32.vlgmr.msra.gmra.mrb[6].mxu1 %v5781_v41 }
 0x251   : > { %v3268_v42 = vpop.f32.mrb[0].mxu0 }
 0x252   : > { %v2593_v20 = vmul.f32 %v3268_v42, %v3268_v42  ;;  %v1254_v54 = vpop.f32.mrb[1].mxu0 }
 0x253   : > { %v3478_v13 = vpop.f32.mrb[0].mxu1  ;;  %v2592_v37 = vmul.f32 %v1254_v54, %v1254_v54 }
 0x254   : > { %v1940_v26 = vpop.f32.mrb[1].mxu1  ;;  %v2595_v45 = vsub.f32 %v2593_v20, %v3478_v13 }
 0x255   : > { %v2594_v46 = vsub.f32 %v2592_v37, %v1940_v26 }
 0x257   : > { %v2596_v23 = vadd.f32 %v2595_v45, %v2594_v46 }
 0x259   : > { %v2597_v5 = vrot.slane %v2596_v23, 4 }
 0x25b   : > { %v2598_v62 = vadd.f32 %v2597_v5, %v2596_v23 }
 0x25d   : > { %v2599_v47 = vrot.slane %v2598_v62, 2 }
 0x25f   : > { %v2600_v7 = vadd.f32 %v2599_v47, %v2598_v62 }
 0x261   : > { %v2601_v51 = vrot.slane %v2600_v7, 1 }
 0x263   : > { %v2602_v57 = vadd.f32 %v2601_v51, %v2600_v7 }
 0x265   : > { %v2603_v33 = vmul.f32 0.03125, %v2602_v57 }
 0x271   : > { %v2038_v29 = vpop.f32.mrb[2].mxu0 }
 0x272   : > { %v3513_v40 = vpop.f32.mrb[3].mxu0 }
 0x273   : > { %v2189_v27 = vpop.f32.mrb[2].mxu1 }
 0x274   : > { %v2190_v3 = vadd.f32 %v2189_v27, %v2038_v29  ;;  %v3548_v15 = vpop.f32.mrb[3].mxu1 }
 0x291   : > { %v2293_v50 = vpop.f32.mrb[4].mxu0 }
 0x292   : > { %v2294_v36 = vadd.f32 %v2293_v50, %v2190_v3  ;;  %v3583_v2 = vpop.f32.mrb[5].mxu0 }
 0x293   : > { %v2382_v30 = vpop.f32.mrb[4].mxu1 }
 0x294   : > { %v3618_v63 = vpop.f32.mrb[5].mxu1  ;;  %v2383_v34 = vadd.f32 %v2382_v30, %v2294_v36 }
 0x2b1   : > { %v2501_v53 = vpop.f32.mrb[6].mxu0 }
 0x2b2   : > { %v2502_v21 = vadd.f32 %v2501_v53, %v2383_v34  ;;  %v3653_v16 = vpop.f32.mrb[7].mxu0 }
 0x2b3   : > { %v2588_v44 = vpop.f32.mrb[6].mxu1 }
 0x2b4   : > { %v3688_v22 = vpop.f32.mrb[7].mxu1  ;;  %v2589_v24 = vadd.f32 %v2588_v44, %v2502_v21 }
 0x2b6   : > { %v2604_v49 = vadd.f32 %v2603_v33, %v2589_v24 }
 0x2b8   : > { %v2607_v18 = vadd.f32 %v2606_v58, %v2604_v49 }
 0x2ba   : > { %2608 = vst [vmem:[%s290_s11] sm:$0x1] %v2607_v18 }
 0x2bb   : > { %4405 = shalt.err (!%p4402_p1)
}
 0x2bc   : > { %s4406_s16 = scalar_lea.hbm %s5882_s29, 16  ;;  %s4410_s17 = scalar_lea.hbm %s5931_s5, 32 }
 0x2bd   : > { %p4407_p6 = scmp.ne.s32.totalorder %s5882_s29, %s4406_s16  ;;  %p4411_p0 = scmp.lt.u32.totalorder %s5882_s29, %s5931_s5 }
 0x2be   : > { %p4412_p12 = scmp.lt.u32.totalorder %s4410_s17, %s4406_s16  ;;  %p4414_p10 = scmp.lt.u32.totalorder %s4406_s16, %s5882_s29 }
 0x2bf   : > { %p4408_p8 = pnand %p4407_p6, %p6153_p13 }
 0x2c0   : > { %p4413_p11 = por %p4412_p12, %p4411_p0 }
 0x2c1   : > { %p4409_p4 = pneg %p4408_p8 }
 0x2c2   : > { %p4415_p3 = por %p4414_p10, %p4413_p11 }
 0x2c4   : > { %p4416_p7 = pnand %p4415_p3, %p4409_p4 }
 0x2c6   : > { %4419 = shalt.err (!%p4416_p7)
}
 0x2c7   : > { %4245 = dma.vmem_to_hbm [thread:$0]  (%p6153_p13), %s5884_s15, 16, %s5882_s29, %s2610_s8  }
 0x2c8 PF: > { %s2634_s24 = sand.u32 1, %s4454_s20   ;;  %p6154_p9 = scmp.ne.s32.totalorder %s6030_s26, 0 }
 0x2c9   : > { %p6155_p2 = scmp.ge.s32.totalorder %s4466_s23, 2  ;;  %s2635_s30 = scalar_lea.sflag [#allocation5], %s2634_s24 }
 0x2cb   : > { %p4259_p5 = pnand %p6155_p2, %p6154_p9 }
 0x2cd   : > { %4449 = dma.done.wait (!%p4259_p5), %s2635_s30, 16  }
 0x2ce   : > { %4451 = vsyncadd (!%p4259_p5), %s2635_s30, 4294967280  ;;  %p22_p1 = scmp.ge.s32.totalorder %s4566_s6, 4   ;;  %s6156_s20 = smov %s4458_s21 }
 0x2cf   : > { %s6157_s21 = smov %s4462_s22  ;;  %s6158_s22 = smov %s4597_s28 }
 0x2d0   : > { %s6159_s23 = smov %s4566_s6  ;;  %24 = sbr.rel (!%p22_p1) target bundleno = 10 (0xa), region = 102 }
 0x2d7   :  { %2639 = vsyncpa [#allocation4], 1 }
 0x2d8   :  { %2641 = vsyncpa [#allocation4 + $0x1], 1 }
 0x2d9   :  { %2642 = vsyncpa [#allocation7], 1 }
 0x2da   :  { %2644 = vsyncpa [#allocation7 + $0x1], 1 }
 0x2db   :  { %2645 = vsyncpa [#allocation5], 1 }
 0x2dc   :  { %2647 = vsyncpa [#allocation5 + $0x1], 1 }

</bundles_post_ra>
